<compile_context>
chip_gen: v6e
topology: v6e:2x2x1
jax: 0.10.0
libtpu: 0.0.40
codegen_flags: <defaults>
</compile_context>

<pallas_src>
import functools

import jax
import jax.numpy as jnp
import numpy as np
from jax import lax
from jax.experimental import pallas as pl
from jax.experimental.pallas import tpu as pltpu

EPS = 1e-5


# --------------------------------------------------------------------------------------
# wrapper-side weight transform
# --------------------------------------------------------------------------------------
def _toeplitz_weight(w, H, W, k, pad, dtype):
    """Fold the (kh, kw) taps and H/W zero padding of a 'same' stride-1 conv3d into one
    matmul weight.

      patch rows  : t                (T rows)
      patch cols  : (kt, h', w', ci) (k*H*W*Cin)
      weight cols : (h, w, co)       (H*W*Cout)
      Wt[(kt,h',w',ci),(h,w,co)] = w[co,ci,kt, h'-h+pad, w'-w+pad] if both offsets are
                                   inside the kernel window, else 0.
    Out-of-image taps simply have no column, which is exact since 'same' padding is zero.
    """
    Cout, Cin = w.shape[0], w.shape[1]
    wt = jnp.transpose(w, (2, 3, 4, 1, 0)).astype(jnp.float32)      # (kt, kh, kw, Cin, Cout)
    oh = jnp.arange(H)[:, None] - jnp.arange(H)[None, :] + pad      # kh index, (H', H)
    ow = jnp.arange(W)[:, None] - jnp.arange(W)[None, :] + pad      # kw index, (W', W)
    vh = (oh >= 0) & (oh < k)
    vw = (ow >= 0) & (ow < k)
    B = wt[:, jnp.clip(oh, 0, k - 1)]                               # (kt, H', H, kw, Cin, Cout)
    B = B[:, :, :, jnp.clip(ow, 0, k - 1)]                          # (kt, H', H, W', W, Cin, Cout)
    mask = vh[None, :, :, None, None, None, None] & vw[None, None, None, :, :, None, None]
    B = jnp.where(mask, B, 0.0)
    B = jnp.transpose(B, (0, 1, 3, 5, 2, 4, 6))                     # (kt, H', W', Cin, H, W, Cout)
    return B.reshape(k * H * W * Cin, H * W * Cout).astype(dtype)


# --------------------------------------------------------------------------------------
# in-kernel helpers
# --------------------------------------------------------------------------------------
def _pad_interior(pad_ref, interior, pad):
    """Zero the two thin T-halo faces (full-lane-width rows) and write the interior."""
    Tp, HWC = pad_ref.shape
    if pad > 0:
        z = jnp.zeros((pad, HWC), pad_ref.dtype)
        pad_ref[0:pad, :] = z
        pad_ref[Tp - pad:Tp, :] = z
    pad_ref[pad:Tp - pad, :] = interior


def _conv_im2col(pad_ref, patch_ref, w_ref, *, k, pad):
    """k lane-dense slab copies (one per temporal tap) + one MXU matmul
    (bf16 operands, f32 accumulation)."""
    Tp, HWC = pad_ref.shape
    T = Tp - 2 * pad
    for kt in range(k):
        patch_ref[:, kt * HWC:(kt + 1) * HWC] = pad_ref[kt:kt + T, :].astype(patch_ref.dtype)
    return jnp.dot(patch_ref[...], w_ref[...], preferred_element_type=jnp.float32)


# --------------------------------------------------------------------------------------
# stage kernels
# --------------------------------------------------------------------------------------
def _conv1_kernel(x_ref, w_ref, y_ref, stats_ref, xpad_ref, patch_ref, *, k, pad):
    """conv1 + per-tile BN1 partial sums (sum, sumsq over T rows; lane-dense)."""
    _pad_interior(xpad_ref, x_ref[0], pad)
    y = _conv_im2col(xpad_ref, patch_ref, w_ref, k=k, pad=pad)      # (T, H*W*Cout) f32
    stats_ref[0, 0:1, :] = jnp.sum(y, axis=0, keepdims=True)
    stats_ref[0, 1:2, :] = jnp.sum(y * y, axis=0, keepdims=True)
    y_ref[0] = y.astype(y_ref.dtype)                                # bf16 HBM round-trip


def _bnrelu_conv2_kernel(y1_ref, scale_ref, shift_ref, w_ref, y2_ref, stats_ref,
                         rpad_ref, patch_ref, *, k, pad):
    """BN1 affine (precomputed, lane-tiled scale/shift) + ReLU + conv2 + BN2 partial sums."""
    r = jnp.maximum(y1_ref[0].astype(jnp.float32) * scale_ref[...] + shift_ref[...], 0.0)
    _pad_interior(rpad_ref, r, pad)
    y = _conv_im2col(rpad_ref, patch_ref, w_ref, k=k, pad=pad)      # (T, H*W*Cout) f32
    stats_ref[0, 0:1, :] = jnp.sum(y, axis=0, keepdims=True)
    stats_ref[0, 1:2, :] = jnp.sum(y * y, axis=0, keepdims=True)
    y2_ref[0] = y.astype(y2_ref.dtype)


def _bn2_add_relu_kernel(x_ref, y2_ref, scale_ref, shift_ref, out_ref):
    """BN2 affine + residual add + final ReLU (fully lane-dense elementwise)."""
    out_ref[0] = jnp.maximum(
        x_ref[0] + (y2_ref[0].astype(jnp.float32) * scale_ref[...] + shift_ref[...]), 0.0)


# --------------------------------------------------------------------------------------
# glue: exact train-mode BN from partial sums -> per-channel affine, tiled to lane width
# --------------------------------------------------------------------------------------
def _bn_affine(stats, gamma, beta, count, C):
    s = jnp.sum(stats, axis=0)                                       # (2, H*W*C)
    s = s.reshape(2, -1, C).sum(axis=1)                              # (2, C): [sum, sumsq]
    mean = s[0] / count
    var = jnp.maximum(s[1] / count - mean * mean, 0.0)               # clamp: cancellation guard
    inv = gamma * lax.rsqrt(var + EPS)
    shift = beta - mean * inv
    hw = stats.shape[-1] // C
    return jnp.tile(inv, hw).reshape(1, -1), jnp.tile(shift, hw).reshape(1, -1)


# --------------------------------------------------------------------------------------
# wrapper
# --------------------------------------------------------------------------------------
def spatio_temporal_res_block(x_ncdhw, params, kernel_size=3):
    """NCDHW in / NCDHW out, matching the PyTorch module with downsample=False and
    fresh-module (training-mode batch-stat) BatchNorm3d semantics."""
    k = kernel_size
    pad = k // 2
    x = jnp.transpose(x_ncdhw, (0, 2, 3, 4, 1)).astype(jnp.float32)  # NDHWC
    N, T, H, W, Cin = x.shape
    w1, w2 = params["w1"], params["w2"]
    Cout = w1.shape[0]
    assert Cin == Cout, "downsample=False path requires in_channels == out_channels"
    HWC = H * W * Cout
    KT = k * H * W * Cin
    count = N * T * H * W

    xl = x.reshape(N, T, HWC)                                        # lane axis = H*W*C
    w1t = _toeplitz_weight(w1, H, W, k, pad, jnp.bfloat16)
    w2t = _toeplitz_weight(w2, H, W, k, pad, jnp.bfloat16)
    g1 = params["gamma1"].astype(jnp.float32)
    b1 = params["beta1"].astype(jnp.float32)
    g2 = params["gamma2"].astype(jnp.float32)
    b2 = params["beta2"].astype(jnp.float32)

    cparams = pltpu.CompilerParams(
        dimension_semantics=("parallel",),           # batch axis: shard across TCs
        vmem_limit_bytes=48 * 1024 * 1024,           # safe on v7x (64 MiB physical) and below
    )

    blk_act = pl.BlockSpec((1, T, HWC), lambda n: (n, 0, 0))
    blk_w = pl.BlockSpec((KT, HWC), lambda n: (0, 0))
    blk_vec = pl.BlockSpec((1, HWC), lambda n: (0, 0))
    blk_st = pl.BlockSpec((1, 2, HWC), lambda n: (n, 0, 0))
    pad_scratch = pltpu.VMEM((T + 2 * pad, HWC), jnp.float32)        # tiny; keeps stores clean
    patch_scratch = pltpu.VMEM((T, KT), jnp.bfloat16)                # bf16 MXU operand

    # -------- stage 1: conv1 + BN1 partial stats --------
    y1, st1 = pl.pallas_call(
        functools.partial(_conv1_kernel, k=k, pad=pad),
        grid=(N,),
        in_specs=[blk_act, blk_w],
        out_specs=(blk_act, blk_st),
        out_shape=(jax.ShapeDtypeStruct((N, T, HWC), jnp.bfloat16),
                   jax.ShapeDtypeStruct((N, 2, HWC), jnp.float32)),
        scratch_shapes=[pad_scratch, patch_scratch],
        compiler_params=cparams,
    )(xl, w1t)

    scale1, shift1 = _bn_affine(st1, g1, b1, count, Cout)

    # -------- stage 2: BN1 affine + ReLU + conv2 + BN2 partial stats --------
    y2, st2 = pl.pallas_call(
        functools.partial(_bnrelu_conv2_kernel, k=k, pad=pad),
        grid=(N,),
        in_specs=[blk_act, blk_vec, blk_vec, blk_w],
        out_specs=(blk_act, blk_st),
        out_shape=(jax.ShapeDtypeStruct((N, T, HWC), jnp.bfloat16),
                   jax.ShapeDtypeStruct((N, 2, HWC), jnp.float32)),
        scratch_shapes=[pad_scratch, patch_scratch],
        compiler_params=cparams,
    )(y1, scale1, shift1, w2t)

    scale2, shift2 = _bn_affine(st2, g2, b2, count, Cout)

    # -------- stage 3: BN2 affine + residual add + final ReLU (lane-dense elementwise) --------
    out = pl.pallas_call(
        _bn2_add_relu_kernel,
        grid=(N,),
        in_specs=[blk_act, blk_act, blk_vec, blk_vec],
        out_specs=blk_act,
        out_shape=jax.ShapeDtypeStruct((N, T, HWC), jnp.float32),
        compiler_params=cparams,
    )(xl, y2, scale2, shift2)

    return jnp.transpose(out.reshape(N, T, H, W, Cout), (0, 4, 1, 2, 3))   # back to NCDHW


# --------------------------------------------------------------------------------------
# pure-JAX reference (ground truth, f32 conv) mirroring the PyTorch forward
# --------------------------------------------------------------------------------------
def _ref_forward(x_ncdhw, params, kernel_size=3):
    k = kernel_size
    pad = k // 2

    def conv3d(x, w):
        return lax.conv_general_dilated(
            x, w, window_strides=(1, 1, 1),
            padding=[(pad, pad)] * 3,
            dimension_numbers=("NCDHW", "OIDHW", "NCDHW"),
            precision=lax.Precision.HIGHEST)

    def bn(y, g, b):
        mean = jnp.mean(y, axis=(0, 2, 3, 4), keepdims=True)
        var = jnp.mean((y - mean) ** 2, axis=(0, 2, 3, 4), keepdims=True)
        inv = 1.0 / jnp.sqrt(var + EPS)
        return (y - mean) * inv * g.reshape(1, -1, 1, 1, 1) + b.reshape(1, -1, 1, 1, 1)

    r = jnp.maximum(bn(conv3d(x_ncdhw, params["w1"]), params["gamma1"], params["beta1"]), 0.0)
    r = bn(conv3d(r, params["w2"]), params["gamma2"], params["beta2"])
    return jnp.maximum(x_ncdhw + r, 0.0)


if __name__ == "__main__":
    key = jax.random.PRNGKey(0)
    N, C, T, H, W = 2, 8, 4, 8, 8   # NCDHW, in_channels == out_channels (downsample=False)
    k = 3
    kx, k1, k2 = jax.random.split(key, 3)

    x = jax.random.normal(kx, (N, C, T, H, W), jnp.float32)
    params = {
        "w1": 0.1 * jax.random.normal(k1, (C, C, k, k, k), jnp.float32),
        "w2": 0.1 * jax.random.normal(k2, (C, C, k, k, k), jnp.float32),
        "gamma1": jnp.ones((C,), jnp.float32),
        "beta1": jnp.zeros((C,), jnp.float32),
        "gamma2": jnp.ones((C,), jnp.float32),
        "beta2": jnp.zeros((C,), jnp.float32),
    }

    out = spatio_temporal_res_block(x, params, kernel_size=k)
    out = jax.block_until_ready(out)
    assert out.shape == (N, C, T, H, W)

    ref = _ref_forward(x, params, kernel_size=k)
    # Kernel matmuls use bf16 operands (f32 accumulation) and y1/y2 make bf16 HBM round-trips
    # (per the perf review); vs the f32 HIGHEST-precision reference, the post-BN worst-case
    # deviation is ~2-3e-2 absolute after two normalizations, so compare at 4e-2 — structural
    # bugs (wrong Toeplitz/tap indexing) would show up as O(1) errors and still be caught.
    np.testing.assert_allclose(np.asarray(out), np.asarray(ref), rtol=4e-2, atol=4e-2)

    print("KERNEL_OK")
</pallas_src>

<mosaic_0001>
module attributes {stable_mosaic.version = 11 : i64} {
  func.func @_conv1_kernel(%arg0: i32, %arg1: memref<1x4x512xf32, #tpu.memory_space<vmem>>, %arg2: memref<1536x512xbf16, #tpu.memory_space<vmem>>, %arg3: memref<1x4x512xbf16, #tpu.memory_space<vmem>>, %arg4: memref<1x2x512xf32, #tpu.memory_space<vmem>>, %arg5: memref<6x512xf32, #tpu.memory_space<vmem>>, %arg6: memref<4x1536xbf16, #tpu.memory_space<vmem>>) attributes {dimension_semantics = [#tpu.dimension_semantics<parallel>], iteration_bounds = array<i64: 2>, scalar_prefetch = 0 : i64, scratch_operands = 2 : i64, tpu.core_type = #tpu.core_type<tc>, window_params = [{transform_indices = @transform_0, window_bounds = array<i64: 1, 4, 512>}, {pipeline_mode = #tpu.pipeline_mode<synchronous>, transform_indices = @transform_1, window_bounds = array<i64: 1536, 512>}, {transform_indices = @transform_2, window_bounds = array<i64: 1, 4, 512>}, {transform_indices = @transform_3, window_bounds = array<i64: 1, 2, 512>}]} {
    %c0 = arith.constant 0 : index
    %c0_0 = arith.constant 0 : index
    %c0_1 = arith.constant 0 : index
    %0 = vector.load %arg1[%c0, %c0_0, %c0_1] : memref<1x4x512xf32, #tpu.memory_space<vmem>>, vector<1x4x512xf32>
    %1 = vector.shape_cast %0 : vector<1x4x512xf32> to vector<4x512xf32>
    %cst = arith.constant 0.000000e+00 : f32
    %2 = vector.broadcast %cst : f32 to vector<1x512xf32>
    %c0_2 = arith.constant 0 : index
    %c0_3 = arith.constant 0 : index
    %3 = vector.load %arg5[%c0_2, %c0_3] : memref<6x512xf32, #tpu.memory_space<vmem>>, vector<1x512xf32>
    tpu.vector_store %arg5[%c0_2, %c0_3], %2 {strides = array<i32>} : memref<6x512xf32, #tpu.memory_space<vmem>>, vector<1x512xf32>,
    %c5 = arith.constant 5 : index
    %c0_4 = arith.constant 0 : index
    %4 = vector.load %arg5[%c5, %c0_4] : memref<6x512xf32, #tpu.memory_space<vmem>>, vector<1x512xf32>
    tpu.vector_store %arg5[%c5, %c0_4], %2 {strides = array<i32>} : memref<6x512xf32, #tpu.memory_space<vmem>>, vector<1x512xf32>,
    %c1 = arith.constant 1 : index
    %c0_5 = arith.constant 0 : index
    %5 = vector.load %arg5[%c1, %c0_5] : memref<6x512xf32, #tpu.memory_space<vmem>>, vector<4x512xf32>
    tpu.vector_store %arg5[%c1, %c0_5], %1 {strides = array<i32>} : memref<6x512xf32, #tpu.memory_space<vmem>>, vector<4x512xf32>,
    %c0_6 = arith.constant 0 : index
    %c0_7 = arith.constant 0 : index
    %6 = vector.load %arg5[%c0_6, %c0_7] : memref<6x512xf32, #tpu.memory_space<vmem>>, vector<4x512xf32>
    %7 = arith.truncf %6 : vector<4x512xf32> to vector<4x512xbf16>
    %c0_8 = arith.constant 0 : index
    %c0_9 = arith.constant 0 : index
    %8 = vector.load %arg6[%c0_8, %c0_9] : memref<4x1536xbf16, #tpu.memory_space<vmem>>, vector<4x512xbf16>
    tpu.vector_store %arg6[%c0_8, %c0_9], %7 {strides = array<i32>} : memref<4x1536xbf16, #tpu.memory_space<vmem>>, vector<4x512xbf16>,
    %c1_10 = arith.constant 1 : index
    %c0_11 = arith.constant 0 : index
    %9 = vector.load %arg5[%c1_10, %c0_11] : memref<6x512xf32, #tpu.memory_space<vmem>>, vector<4x512xf32>
    %10 = arith.truncf %9 : vector<4x512xf32> to vector<4x512xbf16>
    %c0_12 = arith.constant 0 : index
    %c512 = arith.constant 512 : index
    %11 = vector.load %arg6[%c0_12, %c512] : memref<4x1536xbf16, #tpu.memory_space<vmem>>, vector<4x512xbf16>
    tpu.vector_store %arg6[%c0_12, %c512], %10 {strides = array<i32>} : memref<4x1536xbf16, #tpu.memory_space<vmem>>, vector<4x512xbf16>,
    %c2 = arith.constant 2 : index
    %c0_13 = arith.constant 0 : index
    %12 = vector.load %arg5[%c2, %c0_13] : memref<6x512xf32, #tpu.memory_space<vmem>>, vector<4x512xf32>
    %13 = arith.truncf %12 : vector<4x512xf32> to vector<4x512xbf16>
    %c0_14 = arith.constant 0 : index
    %c1024 = arith.constant 1024 : index
    %14 = vector.load %arg6[%c0_14, %c1024] : memref<4x1536xbf16, #tpu.memory_space<vmem>>, vector<4x512xbf16>
    tpu.vector_store %arg6[%c0_14, %c1024], %13 {strides = array<i32>} : memref<4x1536xbf16, #tpu.memory_space<vmem>>, vector<4x512xbf16>,
    %c0_15 = arith.constant 0 : index
    %c0_16 = arith.constant 0 : index
    %15 = vector.load %arg6[%c0_15, %c0_16] : memref<4x1536xbf16, #tpu.memory_space<vmem>>, vector<4x1536xbf16>
    %c0_17 = arith.constant 0 : index
    %c0_18 = arith.constant 0 : index
    %16 = vector.load %arg2[%c0_17, %c0_18] : memref<1536x512xbf16, #tpu.memory_space<vmem>>, vector<1536x512xbf16>
    %cst_19 = arith.constant dense<0.000000e+00> : vector<4x512xf32>
    %17 = tpu.matmul %15, %16, %cst_19 {dimension_numbers = #tpu.dot_dimension_numbers<[1], [0], [0], [1], [0, 0, 1, 1], [], []>} : vector<4x1536xbf16>, vector<1536x512xbf16>, vector<4x512xf32> -> vector<4x512xf32>
    %cst_20 = arith.constant dense<0.000000e+00> : vector<512xf32>
    %18 = vector.multi_reduction <add>, %17, %cst_20 [0] : vector<4x512xf32> to vector<512xf32>
    %19 = vector.shape_cast %18 : vector<512xf32> to vector<1x512xf32>
    %c0_21 = arith.constant 0 : index
    %c0_22 = arith.constant 0 : index
    %c0_23 = arith.constant 0 : index
    %20 = vector.load %arg4[%c0_21, %c0_22, %c0_23] : memref<1x2x512xf32, #tpu.memory_space<vmem>>, vector<1x1x512xf32>
    %21 = vector.shape_cast %20 : vector<1x1x512xf32> to vector<1x512xf32>
    %22 = vector.shape_cast %19 : vector<1x512xf32> to vector<1x1x512xf32>
    tpu.vector_store %arg4[%c0_21, %c0_22, %c0_23], %22 {strides = array<i32>} : memref<1x2x512xf32, #tpu.memory_space<vmem>>, vector<1x1x512xf32>,
    %23 = arith.mulf %17, %17 : vector<4x512xf32>
    %cst_24 = arith.constant dense<0.000000e+00> : vector<512xf32>
    %24 = vector.multi_reduction <add>, %23, %cst_24 [0] : vector<4x512xf32> to vector<512xf32>
    %25 = vector.shape_cast %24 : vector<512xf32> to vector<1x512xf32>
    %c0_25 = arith.constant 0 : index
    %c1_26 = arith.constant 1 : index
    %c0_27 = arith.constant 0 : index
    %26 = vector.load %arg4[%c0_25, %c1_26, %c0_27] : memref<1x2x512xf32, #tpu.memory_space<vmem>>, vector<1x1x512xf32>
    %27 = vector.shape_cast %26 : vector<1x1x512xf32> to vector<1x512xf32>
    %28 = vector.shape_cast %25 : vector<1x512xf32> to vector<1x1x512xf32>
    tpu.vector_store %arg4[%c0_25, %c1_26, %c0_27], %28 {strides = array<i32>} : memref<1x2x512xf32, #tpu.memory_space<vmem>>, vector<1x1x512xf32>,
    %29 = arith.truncf %17 : vector<4x512xf32> to vector<4x512xbf16>
    %c0_28 = arith.constant 0 : index
    %c0_29 = arith.constant 0 : index
    %c0_30 = arith.constant 0 : index
    %30 = vector.load %arg3[%c0_28, %c0_29, %c0_30] : memref<1x4x512xbf16, #tpu.memory_space<vmem>>, vector<1x4x512xbf16>
    %31 = vector.shape_cast %30 : vector<1x4x512xbf16> to vector<4x512xbf16>
    %32 = vector.shape_cast %29 : vector<4x512xbf16> to vector<1x4x512xbf16>
    tpu.vector_store %arg3[%c0_28, %c0_29, %c0_30], %32 {strides = array<i32>} : memref<1x4x512xbf16, #tpu.memory_space<vmem>>, vector<1x4x512xbf16>,
    return
  }
  func.func @transform_0(%arg0: i32) -> (i32, i32, i32) {
    %c0_i32 = arith.constant 0 : i32
    %c0_i32_0 = arith.constant 0 : i32
    %c0_i32_1 = arith.constant 0 : i32
    return %arg0, %c0_i32, %c0_i32_0 : i32, i32, i32
  }
  func.func @transform_1(%arg0: i32) -> (i32, i32) {
    %c0_i32 = arith.constant 0 : i32
    %c0_i32_0 = arith.constant 0 : i32
    %c0_i32_1 = arith.constant 0 : i32
    return %c0_i32, %c0_i32_0 : i32, i32
  }
  func.func @transform_2(%arg0: i32) -> (i32, i32, i32) {
    %c0_i32 = arith.constant 0 : i32
    %c0_i32_0 = arith.constant 0 : i32
    %c0_i32_1 = arith.constant 0 : i32
    return %arg0, %c0_i32, %c0_i32_0 : i32, i32, i32
  }
  func.func @transform_3(%arg0: i32) -> (i32, i32, i32) {
    %c0_i32 = arith.constant 0 : i32
    %c0_i32_0 = arith.constant 0 : i32
    %c0_i32_1 = arith.constant 0 : i32
    return %arg0, %c0_i32, %c0_i32_0 : i32, i32, i32
  }
}

</mosaic_0001>

<bundles_post_ra>
// kernel: tpu_custom_call.1
= control target key start
LH: loop header
LB: loop body
LE: loop exit
PB: predicated region body
PF: predicated region fallthrough
CT: control target
= control target key end

     0   :  { %9 = vsyncpa [#allocation5], 0  ;;  %s5135_s0 = inlined_call_operand.hbm [shape: f32[2,4,512], index: 0, kind: input, shape index: {}]   ;;  %s5136_s1 = inlined_call_operand.hbm [shape: bf16[1536,512], index: 1, kind: input, shape index: {}]   ;;  %s5137_s2 = inlined_call_operand.hbm [shape: bf16[2,4,512], index: 2, kind: output, shape index: {0}]   ;;  %s5138_s3 = inlined_call_operand.hbm [shape: f32[2,2,512], index: 3, kind: output, shape index: {1}]  }
   0x1   :  { %11 = vsyncpa [#allocation5 + $0x1], 0 }
   0x2   :  { %12 = vsyncpa [#allocation8], 0 }
   0x3   :  { %13 = vsyncpa [#allocation6], 0 }
   0x4   :  { %15 = vsyncpa [#allocation6 + $0x1], 0 }
   0x5   :  { %16 = vsyncpa [#allocation11], 0 }
   0x6   :  { %18 = vsyncpa [#allocation11 + $0x1], 0  ;;  %s4771_s12 = smov 0   ;;  %s4773_s13 = smov 0  }
   0x7   :  { %s4775_s14 = smov 0   ;;  %s4777_s15 = smov 0  }
   0x8 LB: > { %s4792_s16 = sadd.s32 4294967295, %s4740_s15   ;;  %s3527_s17 = sadd.s32 4294967294, %s4740_s15   ;;  %s4740_s15 = sphi %s4777_s15, %s5166_s15   ;;  %s4736_s14 = sphi %s4775_s14, %s5165_s14   ;;  %s4732_s13 = sphi %s4773_s13, %s5164_s13   ;;  %s4728_s12 = sphi %s4771_s12, %s5163_s12  }
   0x9   : > { %p44_p0 = scmp.ne.s32.totalorder %s4732_s13, %s4728_s12  ;;  %p5139_p1 = scmp.eq.s32.totalorder %s4792_s16, 0 }
   0xa   : > { %p95_p3 = scmp.eq.s32.totalorder %s3527_s17, 1  ;;  %p3528_p5 = scmp.ge.s32.totalorder %s4740_s15, 1 }
   0xb   : > { %p4801_p4 = por %p5139_p1, %p44_p0  ;;  %p128_p7 = scmp.lt.s32.totalorder %s4740_s15, 3 }
   0xc   : > { %p4806_p6 = por %p95_p3, %p44_p0  ;;  %s4742_s21 = smov [#allocation7]  }
   0xd   : > { %s5143_s18 = scalar_select %p4801_p4, 1, 0 }
   0xe   : > { %s5144_s19 = scalar_select %p4806_p6, 1, 0 }
   0xf   : > { %p4811_p8 = pnand %p3528_p5, %p128_p7  ;;  %s140_s22 = sshll.u32 %s4742_s21, 4  ;;  %s141_s22 = int_to_ptr.vmem [resolvable:$true] %s140_s22 }
  0x10   : > { %s4825_s24 = sadd.s32 1, %s4740_s15   ;;  %s31_s25 = sadd.s32 1, %s4736_s14 }
  0x11   : > { %s5145_s20 = scalar_select %p4811_p8, 1, 0 }
  0x12   : > { %p3955_p9 = pneg %p4811_p8  ;;  %s28_s26 = ssub.s32 %s4740_s15, %s4825_s24 }
  0x13   : > { %s4599_s27 = scalar_lea.vmem %s141_s22, 49152  ;;  %p4607_p5 = scmp.lt.s32.totalorder %s141_s22, %s141_s22 }
  0x14   : > { %p4820_p11 = pnand %p3955_p9, %p5139_p1  ;;  %p4600_p13 = scmp.ne.s32.totalorder %s141_s22, %s4599_s27 }
  0x15   : > { %p4608_p7 = scmp.lt.s32.totalorder %s4599_s27, %s4599_s27 }
  0x16   : > { %p4590_p12 = pneg %p4820_p11 }
  0x17   : > { %p4609_p10 = por %p4608_p7, %p4607_p5 }
  0x18   : > { %p4602_p0 = pnand %p4600_p13, %p4590_p12 }
  0x1a   : > { %p4603_p3 = pneg %p4602_p0 }
  0x1c   : > { %p4610_p2 = pnand %p4609_p10, %p4603_p3 }
  0x1e   : > { %4613 = shalt.err (!%p4610_p2)
}
  0x1f   : > { %s4743_s28 = smov 256   ;;  %s4744_s29 = smov 16  }
  0x20   : > { %3958 = dma.hbm_to_vmem [thread:$0]  (!%p4820_p11), %s5136_s1, 49152, %s141_s22, [#allocation8], %s4743_s28, %s4743_s28, %s4744_s29  }
  0x21   : > { %p29_p9 = scmp.eq.s32.totalorder %s28_s26, 0  ;;  %p38_p12 = scmp.ne.s32.totalorder %s4736_s14, %s4732_s13 }
  0x22   : > { %p39_p10 = scmp.eq.s32.totalorder %s4740_s15, 0  ;;  %p3971_p2 = scmp.lt.s32.totalorder %s4740_s15, 2 }
  0x23   : > { %s4842_s5 = scalar_select %p29_p9, %s4736_s14, %s31_s25  }
  0x24   : > { %p40_p13 = por %p39_p10, %p38_p12  ;;  %p5147_p0 = scmp.eq.s32.totalorder %s4792_s16, 1 }
  0x25   : > { %s154_s7 = sand.u32 1, %s4736_s14   ;;  %s3941_s8 = sshll.u32 %s4740_s15, 8 }
  0x26   : > { %p4846_p3 = por %p5147_p0, %p38_p12  ;;  %s3531_s9 = sshll.u32 %s154_s7, 4 }
  0x27   : > { %s4855_s17 = scalar_lea.hbm %s5135_s0, %s3941_s8  ;;  %s158_s21 = scalar_lea.vmem [#allocation4], %s3531_s9 }
  0x28   : > { %s5148_s6 = scalar_select %p4846_p3, 1, 0 }
  0x29   : > { %s166_s22 = sshll.u32 %s158_s21, 4  ;;  %p4857_p11 = pnand %p3971_p2, %p40_p13  ;;  %s167_s22 = int_to_ptr.vmem [resolvable:$true] %s166_s22 }
  0x2a   : > { %s155_s25 = scalar_lea.sflag [#allocation5], %s154_s7  ;;  %s4614_s26 = scalar_lea.hbm %s4855_s17, 256 }
  0x2b   : > { %p4615_p5 = scmp.ne.s32.totalorder %s4855_s17, %s4614_s26  ;;  %p4616_p7 = pneg %p4857_p11 }
  0x2c   : > { %s4619_s29 = scalar_lea.hbm %s5135_s0, 512  ;;  %p4620_p10 = scmp.lt.s32.totalorder %s4855_s17, %s5135_s0 }
  0x2d   : > { %p4617_p9 = pnand %p4616_p7, %p4615_p5  ;;  %p4621_p2 = scmp.lt.s32.totalorder %s4619_s29, %s4614_s26 }
  0x2f   : > { %p4618_p12 = pneg %p4617_p9  ;;  %p4622_p13 = por %p4621_p2, %p4620_p10 }
  0x31   : > { %p4623_p0 = pnand %p4622_p13, %p4618_p12 }
  0x33   : > { %4626 = shalt.err (!%p4623_p0)
}
  0x34   : > { %s4627_s8 = scalar_lea.vmem %s167_s22, 256  ;;  %s4745_s7 = smov [#allocation4]  }
  0x35   : > { %p4628_p1 = scmp.ne.s32.totalorder %s167_s22, %s4627_s8  ;;  %s4632_s9 = sshll.u32 %s4745_s7, 4  ;;  %s4633_s9 = int_to_ptr.vmem [resolvable:$false] %s4632_s9 }
  0x36   : > { %s4634_s10 = scalar_lea.vmem %s4633_s9, 512  ;;  %p4635_p5 = scmp.lt.s32.totalorder %s167_s22, %s4633_s9 }
  0x37   : > { %p4630_p6 = pnand %p4628_p1, %p4616_p7  ;;  %p4636_p9 = scmp.lt.s32.totalorder %s4634_s10, %s4627_s8 }
  0x39   : > { %p4631_p3 = pneg %p4630_p6  ;;  %p4637_p4 = por %p4636_p9, %p4635_p5 }
  0x3b   : > { %p4638_p8 = pnand %p4637_p4, %p4631_p3 }
  0x3d   : > { %4641 = shalt.err (!%p4638_p8)
}
  0x3e   : > { %3962 = dma.hbm_to_vmem [thread:$0]  (!%p4857_p11), %s4855_s17, 256, %s167_s22, %s155_s25  }
  0x3f   : > { %p5150_p12 = scmp.ne.s32.totalorder %s5145_s20, 0 }
  0x40   : > { %s4878_s11 = sand.u32 (!%p5150_p12), 1, %s4732_s13   ;;  %p5151_p1 = scmp.ne.s32.totalorder (!%p5150_p12), %s5143_s18, 0 }
  0x41   : > { %175 = sbr.rel (%p5150_p12) target bundleno = 704 (0x2c0), region = 28  ;;  %s3535_s21 = sshll.u32 (!%p5150_p12), %s4878_s11, 4 }
  0x42   : > { %s178_s26 = scalar_lea.sflag (!%p5150_p12), [#allocation5], %s4878_s11  ;;  %s4882_s27 = scalar_lea.vmem (!%p5150_p12), [#allocation4], %s3535_s21 }
  0x46   : > { %4711 = dma.done.wait (%p5151_p1), %s178_s26, 256  }
  0x47   : > { %4713 = vsyncadd (%p5151_p1), %s178_s26, 4294967040  ;;  %p5152_p4 = scmp.eq.s32.totalorder %s4792_s16, 0 }
  0x49   : > { %4715 = dma.done.wait (%p5152_p4), [#allocation8], 49152   ;;  %p5153_p6 = pmov %p5152_p4 }
  0x4a   : > { %v215_v0 = vlaneseq  ;;  %v4746_v2 = vmov 0.0   ;;  %v4012_v3 = vld [vmem:[#allocation7 + $0xe4] ss:$16 sps:$4 sm:$0xff]   ;;  %v4016_v5 = vld [vmem:[#allocation7 + $0xe0] ss:$16 sps:$4 sm:$0xff]   ;;  %v214_v50 = vld [vmem:[%s4882_s27 + $0x8] sm:$0xff] }
  0x4b   : > { %4717 = vsyncadd (%p5153_p6), [#allocation8], 4294918144  ;;  %v4014_v4 = vld [vmem:[#allocation7 + $0x2e4] ss:$16 sps:$4 sm:$0xff]   ;;  %2740 = vmatprep.subr.bf16.mxu0 %v4012_v3  ;;  %v4017_v6 = vld [vmem:[#allocation7 + $0x2e0] ss:$16 sps:$4 sm:$0xff]   ;;  %v227_v55 = vcombine.high %v214_v50, %v214_v50 }
  0x4c   : > { %vm4893_vm0 = vcmp.lt.s32.totalorder %v215_v0, 512  ;;  %2781 = vmatprep.subr.bf16.mxu1 %v4014_v4  ;;  %v4018_v7 = vld [vmem:[#allocation7 + $0xc4] ss:$16 sps:$4 sm:$0xff]   ;;  %2741 = vmatpush1.bf16.msra.mxu0 %v4016_v5  ;;  %v4022_v9 = vld [vmem:[#allocation7 + $0xc0] ss:$16 sps:$4 sm:$0xff]   ;;  %v230_v56 = vrot.slane %v214_v50, 7 }
  0x4d   : > { %219 = vst.msk [vmem:[#allocation2] ss:$8 sm:$0xf] %vm4893_vm0, %v4746_v2  ;;  %222 = vst.msk [vmem:[#allocation2 + $0x5] ss:$8 sm:$0xf] %vm4893_vm0, %v4746_v2  ;;  %2782 = vmatpush1.bf16.msra.mxu1 %v4017_v6  ;;  %2742 = vmatprep.subr.bf16.mxu0 %v4018_v7 }
  0x4e   : > { %v4020_v8 = vld [vmem:[#allocation7 + $0x2c4] ss:$16 sps:$4 sm:$0xff]   ;;  %v4023_v10 = vld [vmem:[#allocation7 + $0x2c0] ss:$16 sps:$4 sm:$0xff]   ;;  %v4747_v60 = vmov 1983009808  }
  0x4f   : > { %2783 = vmatprep.subr.bf16.mxu1 %v4020_v8  ;;  %v4024_v11 = vld [vmem:[#allocation7 + $0xa4] ss:$16 sps:$4 sm:$0xff]   ;;  %v4028_v13 = vld [vmem:[#allocation7 + $0xa0] ss:$16 sps:$4 sm:$0xff]   ;;  %v255_v61 = vunpack.c.l.s4 %v4747_v60  ;;  %v231_v62 = vrot.slane %v227_v55, 7  ;;  %v4904_v6 = vshrl.u32 %v215_v0, 7 }
  0x50   : > { %v4026_v12 = vld [vmem:[#allocation7 + $0x2a4] ss:$16 sps:$4 sm:$0xff]   ;;  %v4029_v14 = vld [vmem:[#allocation7 + $0x2a0] ss:$16 sps:$4 sm:$0xff]   ;;  %2743 = vmatpush1.bf16.msra.mxu0 %v4022_v9  ;;  %238 = vst [vmem:[#allocation2 + $0x10] sm:$0x1e] %v230_v56 }
  0x51   : > { %2784 = vmatpush1.bf16.msra.mxu1 %v4023_v10  ;;  %v4030_v15 = vld [vmem:[#allocation7 + $0x84] ss:$16 sps:$4 sm:$0xff]   ;;  %2744 = vmatprep.subr.bf16.mxu0 %v4024_v11  ;;  %v4034_v17 = vld [vmem:[#allocation7 + $0x80] ss:$16 sps:$4 sm:$0xff]   ;;  %239 = vst [vmem:[#allocation2 + $0x18] sm:$0x1e] %v231_v62  ;;  %v256_v5 = vunpack.c.0.s8 %v255_v61 }
  0x52   : > { %2785 = vmatprep.subr.bf16.mxu1 %v4026_v12  ;;  %v4032_v16 = vld [vmem:[#allocation7 + $0x284] ss:$16 sps:$4 sm:$0xff]   ;;  %v4035_v18 = vld [vmem:[#allocation7 + $0x280] ss:$16 sps:$4 sm:$0xff]   ;;  %vm301_vm1 = vsmask.f32 1280 }
  0x53   : > { %v4036_v19 = vld [vmem:[#allocation7 + $0x64] ss:$16 sps:$4 sm:$0xff]   ;;  %v4040_v21 = vld [vmem:[#allocation7 + $0x60] ss:$16 sps:$4 sm:$0xff]   ;;  %vm302_vm2 = vsmask.f32 3336 }
  0x54   : > { %2745 = vmatpush1.bf16.msra.mxu0 %v4028_v13  ;;  %v4038_v20 = vld [vmem:[#allocation7 + $0x264] ss:$16 sps:$4 sm:$0xff]   ;;  %v4041_v22 = vld [vmem:[#allocation7 + $0x260] ss:$16 sps:$4 sm:$0xff]   ;;  %v4907_v13 = vsub.s32 %v256_v5, %v4904_v6  ;;  %vm4933_vm3 = vmor %vm301_vm1, %vm302_vm2  ;;  %vm304_vm4 = vsmask.f32 5392 }
  0x55   : > { %2786 = vmatpush1.bf16.msra.mxu1 %v4029_v14  ;;  %2746 = vmatprep.subr.bf16.mxu0 %v4030_v15  ;;  %v4042_v23 = vld [vmem:[#allocation7 + $0x44] ss:$16 sps:$4 sm:$0xff]   ;;  %v4046_v25 = vld [vmem:[#allocation7 + $0x40] ss:$16 sps:$4 sm:$0xff]   ;;  %vm306_vm5 = vsmask.f32 7448  ;;  %vm305_vm6 = vmor %vm4933_vm3, %vm304_vm4 }
  0x56   : > { %2787 = vmatprep.subr.bf16.mxu1 %v4032_v16  ;;  %v4044_v24 = vld [vmem:[#allocation7 + $0x244] ss:$16 sps:$4 sm:$0xff]   ;;  %v4047_v26 = vld [vmem:[#allocation7 + $0x240] ss:$16 sps:$4 sm:$0xff]   ;;  %vm307_vm7 = vmor %vm305_vm6, %vm306_vm5  ;;  %vm354_vm8 = vcmask 1040384   ;;  %vm355_vm9 = vcmask 1042434  }
  0x57   : > { %v4048_v27 = vld [vmem:[#allocation7 + $0x24] ss:$16 sps:$4 sm:$0xff]   ;;  %v4052_v29 = vld [vmem:[#allocation7 + $0x20] ss:$16 sps:$4 sm:$0xff]   ;;  %vm4959_vm10 = vmor %vm354_vm8, %vm355_vm9  ;;  %vm357_vm11 = vcmask 1044484   ;;  %vm359_vm13 = vcmask 1046534  }
  0x58   : > { %2747 = vmatpush1.bf16.msra.mxu0 %v4034_v17  ;;  %v4050_v28 = vld [vmem:[#allocation7 + $0x224] ss:$16 sps:$4 sm:$0xff]   ;;  %v4053_v30 = vld [vmem:[#allocation7 + $0x220] ss:$16 sps:$4 sm:$0xff]   ;;  %v243_v15 = vld [vmem:[#allocation2 + $0x18] sm:$0xf] }
  0x59   : > { %2788 = vmatpush1.bf16.msra.mxu1 %v4035_v18  ;;  %2748 = vmatprep.subr.bf16.mxu0 %v4036_v19  ;;  %v4054_v31 = vld [vmem:[#allocation7 + $0x4] ss:$16 sps:$4 sm:$0xff]   ;;  %v4058_v33 = vld [vmem:[#allocation7] ss:$16 sps:$4 sm:$0xff]   ;;  %v274_v62 = vld [vmem:[#allocation2 + $0x18] sm:$0x1e] }
  0x5a   : > { %2789 = vmatprep.subr.bf16.mxu1 %v4038_v20  ;;  %v4056_v32 = vld [vmem:[#allocation7 + $0x204] ss:$16 sps:$4 sm:$0xff]   ;;  %v4059_v34 = vld [vmem:[#allocation7 + $0x200] ss:$16 sps:$4 sm:$0xff]   ;;  %vm358_vm12 = vmor %vm4959_vm10, %vm357_vm11  ;;  %vm3232_vm15 = vcmask 1043456   ;;  %s3537_s18 = sshll.u32 %s4878_s11, 3 }
  0x5b   : > { %v4060_v35 = vld [vmem:[#allocation7 + $0x1e4] ss:$16 sps:$4 sm:$0xff]   ;;  %v4064_v37 = vld [vmem:[#allocation7 + $0x1e0] ss:$16 sps:$4 sm:$0xff]   ;;  %vm360_vm14 = vmor %vm358_vm12, %vm359_vm13  ;;  %s3942_s20 = sshll.u32 %s4792_s16, 7  ;;  %s205_s17 = scalar_lea.vmem [#allocation9], %s3537_s18 }
  0x5c   : > { %2749 = vmatpush1.bf16.msra.mxu0 %v4040_v21  ;;  %v4062_v36 = vld [vmem:[#allocation7 + $0x3e4] ss:$16 sps:$4 sm:$0xff]   ;;  %v4065_v38 = vld [vmem:[#allocation7 + $0x3e0] ss:$16 sps:$4 sm:$0xff]   ;;  %s3401_s22 = sshll.u32 %s205_s17, 4  ;;  %s5055_s28 = scalar_lea.hbm %s5137_s2, %s3942_s20  ;;  %s5057_s22 = int_to_ptr.vmem [resolvable:$true] %s3401_s22 }
  0x5d   : > { %2790 = vmatpush1.bf16.msra.mxu1 %v4041_v22  ;;  %2750 = vmatprep.subr.bf16.mxu0 %v4042_v23  ;;  %v4066_v39 = vld [vmem:[#allocation7 + $0x1c4] ss:$16 sps:$4 sm:$0xff]   ;;  %v4070_v41 = vld [vmem:[#allocation7 + $0x1c0] ss:$16 sps:$4 sm:$0xff]   ;;  %s3382_s29 = scalar_lea.sflag [#allocation6], %s4878_s11  ;;  %s4642_s30 = scalar_lea.vmem %s5057_s22, 128 }
  0x5e   : > { %2791 = vmatprep.subr.bf16.mxu1 %v4044_v24  ;;  %v4068_v40 = vld [vmem:[#allocation7 + $0x3c4] ss:$16 sps:$4 sm:$0xff]   ;;  %v4071_v42 = vld [vmem:[#allocation7 + $0x3c0] ss:$16 sps:$4 sm:$0xff]   ;;  %p4643_p8 = scmp.ne.s32.totalorder %s5057_s22, %s4642_s30  ;;  %p5160_p3 = scmp.ne.s32.totalorder %s5148_s6, 0 }
  0x5f   : > { %v4072_v43 = vld [vmem:[#allocation7 + $0x1a4] ss:$16 sps:$4 sm:$0xff]   ;;  %v4076_v45 = vld [vmem:[#allocation7 + $0x1a0] ss:$16 sps:$4 sm:$0xff]   ;;  %s4749_s4 = smov [#allocation9]  }
  0x60   : > { %2751 = vmatpush1.bf16.msra.mxu0 %v4046_v25  ;;  %v4074_v44 = vld [vmem:[#allocation7 + $0x3a4] ss:$16 sps:$4 sm:$0xff]   ;;  %v4077_v46 = vld [vmem:[#allocation7 + $0x3a0] ss:$16 sps:$4 sm:$0xff]   ;;  %p4644_p11 = pnand %p4643_p8, %p5160_p3  ;;  %s4646_s8 = sshll.u32 %s4749_s4, 4  ;;  %s4647_s8 = int_to_ptr.vmem [resolvable:$false] %s4646_s8 }
  0x61   : > { %2792 = vmatpush1.bf16.msra.mxu1 %v4047_v26  ;;  %2752 = vmatprep.subr.bf16.mxu0 %v4048_v27  ;;  %v4078_v47 = vld [vmem:[#allocation7 + $0x184] ss:$16 sps:$4 sm:$0xff]   ;;  %v4082_v53 = vld [vmem:[#allocation7 + $0x180] ss:$16 sps:$4 sm:$0xff]   ;;  %s4648_s7 = scalar_lea.vmem %s4647_s8, 256  ;;  %p4649_p10 = scmp.lt.s32.totalorder %s5057_s22, %s4647_s8 }
  0x62   : > { %2793 = vmatprep.subr.bf16.mxu1 %v4050_v28  ;;  %v4080_v48 = vld [vmem:[#allocation7 + $0x384] ss:$16 sps:$4 sm:$0xff]   ;;  %v4083_v54 = vld [vmem:[#allocation7 + $0x380] ss:$16 sps:$4 sm:$0xff]   ;;  %p4645_p7 = pneg %p4644_p11  ;;  %p4650_p2 = scmp.lt.s32.totalorder %s4648_s7, %s4642_s30 }
  0x63   : > { %v213_v49 = vld [vmem:[%s4882_s27] sm:$0xff] }
  0x64   : > { %2753 = vmatpush1.bf16.msra.mxu0 %v4052_v29  ;;  %v226_v51 = vcombine.high %v213_v49, %v213_v49  ;;  %v228_v52 = vrot.slane %v213_v49, 7  ;;  %v4084_v57 = vld [vmem:[#allocation7 + $0x164] ss:$16 sps:$4 sm:$0xff]   ;;  %v4088_v63 = vld [vmem:[#allocation7 + $0x160] ss:$16 sps:$4 sm:$0xff]   ;;  %p4651_p13 = por %p4650_p2, %p4649_p10 }
  0x65   : > { %2794 = vmatpush1.bf16.msra.mxu1 %v4053_v30  ;;  %2754 = vmatprep.subr.bf16.mxu0 %v4054_v31  ;;  %v4086_v58 = vld [vmem:[#allocation7 + $0x364] ss:$16 sps:$4 sm:$0xff]   ;;  %v4089_v2 = vld [vmem:[#allocation7 + $0x360] ss:$16 sps:$4 sm:$0xff]  }
  0x66   : > { %2795 = vmatprep.subr.bf16.mxu1 %v4056_v32  ;;  %v229_v59 = vrot.slane %v226_v51, 7  ;;  %236 = vst [vmem:[#allocation2] sm:$0x1e] %v228_v52  ;;  %v4090_v3 = vld [vmem:[#allocation7 + $0x144] ss:$16 sps:$4 sm:$0xff]   ;;  %p4652_p0 = pnand %p4651_p13, %p4645_p7 }
  0x67   : > { %v4092_v4 = vld [vmem:[#allocation7 + $0x344] ss:$16 sps:$4 sm:$0xff]   ;;  %v4094_v7 = vld [vmem:[#allocation7 + $0x140] ss:$16 sps:$4 sm:$0xff]  }
  0x68   : > { %2755 = vmatpush1.bf16.msra.mxu0 %v4058_v33  ;;  %237 = vst [vmem:[#allocation2 + $0x8] sm:$0x1e] %v229_v59  ;;  %v4095_v8 = vld [vmem:[#allocation7 + $0x340] ss:$16 sps:$4 sm:$0xff]   ;;  %v4096_v9 = vld [vmem:[#allocation7 + $0x124] ss:$16 sps:$4 sm:$0xff]  }
  0x69   : > { %2796 = vmatpush1.bf16.msra.mxu1 %v4059_v34  ;;  %2756 = vmatprep.subr.bf16.mxu0 %v4060_v35  ;;  %v4098_v10 = vld [vmem:[#allocation7 + $0x324] ss:$16 sps:$4 sm:$0xff]   ;;  %v242_v12 = vld [vmem:[#allocation2 + $0x10] sm:$0xf] }
  0x6a   : > { %2797 = vmatprep.subr.bf16.mxu1 %v4062_v36  ;;  %v4100_v0 = vld [vmem:[#allocation7 + $0x120] ss:$16 sps:$4 sm:$0xff]   ;;  %v3540_v18 = vpack.c.bf16 %v243_v15, %v242_v12  ;;  %v4102_v19 = vld [vmem:[#allocation7 + $0x104] ss:$16 sps:$4 sm:$0xff]  }
  0x6b   : > { %v4101_v17 = vld [vmem:[#allocation7 + $0x320] ss:$16 sps:$4 sm:$0xff]   ;;  %v4104_v20 = vld [vmem:[#allocation7 + $0x304] ss:$16 sps:$4 sm:$0xff]  }
  0x6c   : > { %2757 = vmatpush2.bf16.msra.mxu0 %v4064_v37  ;;  %v267_v22 = vrot.slane %v3540_v18, %v4907_v13  ;;  %v4106_v23 = vld [vmem:[#allocation7 + $0x100] ss:$16 sps:$4 sm:$0xff]   ;;  %v4110_v27 = vld [vmem:[#allocation7 + $0x4e4] ss:$16 sps:$4 sm:$0xff]  }
  0x6d   : > { %2798 = vmatpush2.bf16.msra.mxu1 %v4065_v38  ;;  %2758 = vmatprep.subr.bf16.mxu0 %v4066_v39  ;;  %v240_v11 = vld [vmem:[#allocation2] sm:$0xf]  ;;  %v4113_v28 = vld [vmem:[#allocation7 + $0x6e4] ss:$16 sps:$4 sm:$0xff]  }
  0x6e   : > { %2799 = vmatprep.subr.bf16.mxu1 %v4068_v40  ;;  %v4107_v24 = vld [vmem:[#allocation7 + $0x300] ss:$16 sps:$4 sm:$0xff]   ;;  %v3944_v26 = vcombine.low %v267_v22, %v267_v22  ;;  %v4116_v35 = vld [vmem:[#allocation7 + $0x4c4] ss:$16 sps:$4 sm:$0xff]  }
  0x6f   : > { %v241_v14 = vld [vmem:[#allocation2 + $0x8] sm:$0xf]  ;;  %v4108_v33 = vld [vmem:[#allocation7 + $0x4e0] ss:$16 sps:$4 sm:$0xff]   ;;  %v4119_v36 = vld [vmem:[#allocation7 + $0x6c4] ss:$16 sps:$4 sm:$0xff]  }
  0x70   : > { %2759 = vmatpush2.bf16.msra.mxu0 %v4070_v41  ;;  %v3539_v16 = vpack.c.bf16 %v241_v14, %v240_v11  ;;  %v4915_v30 = vrot.slane %v3944_v26, %v4907_v13  ;;  %v4111_v34 = vld [vmem:[#allocation7 + $0x6e0] ss:$16 sps:$4 sm:$0xff]   ;;  %v4122_v39 = vld [vmem:[#allocation7 + $0x4a4] ss:$16 sps:$4 sm:$0xff]   ;;  %v272_v60 = vld [vmem:[#allocation2 + $0x8] sm:$0x1e] }
  0x71   : > { %2800 = vmatpush2.bf16.msra.mxu1 %v4071_v42  ;;  %2760 = vmatprep.subr.bf16.mxu0 %v4072_v43  ;;  %v4114_v37 = vld [vmem:[#allocation7 + $0x4c0] ss:$16 sps:$4 sm:$0xff]   ;;  %v4125_v40 = vld [vmem:[#allocation7 + $0x6a4] ss:$16 sps:$4 sm:$0xff]  }
  0x72   : > { %2801 = vmatprep.subr.bf16.mxu1 %v4074_v44  ;;  %v260_v21 = vrot.slane %v3539_v16, %v4907_v13  ;;  %v4923_v32 = vcombine.high %v4915_v30, %v4915_v30  ;;  %v4117_v38 = vld [vmem:[#allocation7 + $0x6c0] ss:$16 sps:$4 sm:$0xff]   ;;  %v4128_v43 = vld [vmem:[#allocation7 + $0x484] ss:$16 sps:$4 sm:$0xff]  }
  0x73   : > { %v4120_v41 = vld [vmem:[#allocation7 + $0x4a0] ss:$16 sps:$4 sm:$0xff]   ;;  %v4131_v44 = vld [vmem:[#allocation7 + $0x684] ss:$16 sps:$4 sm:$0xff]  }
  0x74   : > { %2761 = vmatpush2.bf16.msra.mxu0 %v4076_v45  ;;  %v268_v25 = vcombine.low %v260_v21, %v267_v22  ;;  %2813 = vmatprep.mubr.bf16.mxu1 %v4923_v32  ;;  %v4123_v42 = vld [vmem:[#allocation7 + $0x6a0] ss:$16 sps:$4 sm:$0xff]   ;;  %v4140_v51 = vld [vmem:[#allocation7 + $0x444] ss:$16 sps:$4 sm:$0xff]  }
  0x75   : > { %2802 = vmatpush2.bf16.msra.mxu1 %v4077_v46  ;;  %2762 = vmatprep.subr.bf16.mxu0 %v4078_v47  ;;  %v4126_v45 = vld [vmem:[#allocation7 + $0x480] ss:$16 sps:$4 sm:$0xff]   ;;  %v4134_v47 = vld [vmem:[#allocation7 + $0x464] ss:$16 sps:$4 sm:$0xff]  }
  0x76   : > { %2803 = vmatprep.subr.bf16.mxu1 %v4080_v48  ;;  %v4912_v29 = vrot.slane %v268_v25, %v4907_v13  ;;  %v4129_v46 = vld [vmem:[#allocation7 + $0x680] ss:$16 sps:$4 sm:$0xff]   ;;  %v4137_v48 = vld [vmem:[#allocation7 + $0x664] ss:$16 sps:$4 sm:$0xff]  }
  0x77   : > { %v4132_v49 = vld [vmem:[#allocation7 + $0x460] ss:$16 sps:$4 sm:$0xff]   ;;  %v4143_v52 = vld [vmem:[#allocation7 + $0x644] ss:$16 sps:$4 sm:$0xff]  }
  0x78   : > { %2763 = vmatpush2.bf16.msra.mxu0 %v4082_v53  ;;  %v4919_v31 = vcombine.high %v4912_v29, %v4912_v29  ;;  %v4135_v50 = vld [vmem:[#allocation7 + $0x660] ss:$16 sps:$4 sm:$0xff]   ;;  %v4146_v55 = vld [vmem:[#allocation7 + $0x424] ss:$16 sps:$4 sm:$0xff]  }
  0x79   : > { %2804 = vmatpush2.bf16.msra.mxu1 %v4083_v54  ;;  %2764 = vmatprep.subr.bf16.mxu0 %v4084_v57  ;;  %v4138_v53 = vld [vmem:[#allocation7 + $0x440] ss:$16 sps:$4 sm:$0xff]   ;;  %v4149_v56 = vld [vmem:[#allocation7 + $0x624] ss:$16 sps:$4 sm:$0xff]  }
  0x7a   : > { %2805 = vmatprep.subr.bf16.mxu1 %v4086_v58  ;;  %2772 = vmatprep.mubr.bf16.mxu0 %v4919_v31  ;;  %v4141_v54 = vld [vmem:[#allocation7 + $0x640] ss:$16 sps:$4 sm:$0xff]   ;;  %v4158_v11 = vld [vmem:[#allocation7 + $0x5e4] ss:$16 sps:$4 sm:$0xff]  }
  0x7b   : > { %v4144_v57 = vld [vmem:[#allocation7 + $0x420] ss:$16 sps:$4 sm:$0xff]   ;;  %v4161_v12 = vld [vmem:[#allocation7 + $0x7e4] ss:$16 sps:$4 sm:$0xff]  }
  0x7c   : > { %2765 = vmatpush2.bf16.msra.mxu0 %v4088_v63  ;;  %v4147_v58 = vld [vmem:[#allocation7 + $0x620] ss:$16 sps:$4 sm:$0xff]   ;;  %v4167_v21 = vld [vmem:[#allocation7 + $0x7c4] ss:$16 sps:$4 sm:$0xff]  }
  0x7d   : > { %2806 = vmatpush2.bf16.msra.mxu1 %v4089_v2  ;;  %2766 = vmatprep.subr.bf16.mxu0 %v4090_v3  ;;  %v271_v59 = vld [vmem:[#allocation2] sm:$0x1e]  ;;  %v273_v61 = vld [vmem:[#allocation2 + $0x10] sm:$0x1e] }
  0x7e   : > { %2807 = vmatprep.subr.bf16.mxu1 %v4092_v4  ;;  %v3541_v63 = vpack.c.bf16 %v272_v60, %v271_v59  ;;  %v4152_v2 = vld [vmem:[#allocation7 + $0x404] ss:$16 sps:$4 sm:$0xff]   ;;  %v3542_v4 = vpack.c.bf16 %v274_v62, %v273_v61  ;;  %v4156_v16 = vld [vmem:[#allocation7 + $0x5e0] ss:$16 sps:$4 sm:$0xff]  }
  0x7f   : > { %v4155_v3 = vld [vmem:[#allocation7 + $0x604] ss:$16 sps:$4 sm:$0xff]   ;;  %v4198_v61 = vld [vmem:[#allocation7 + $0x500] ss:$16 sps:$4 sm:$0xff]  }
  0x80   : > { %2767 = vmatpush2.bf16.msra.mxu0 %v4094_v7  ;;  %v291_v5 = vrot.slane %v3541_v63, %v4907_v13  ;;  %v298_v7 = vrot.slane %v3542_v4, %v4907_v13  ;;  %v4200_v59 = vld [vmem:[#allocation7 + $0x504] ss:$16 sps:$4 sm:$0xff]   ;;  %v4201_v62 = vld [vmem:[#allocation7 + $0x700] ss:$16 sps:$4 sm:$0xff]  }
  0x81   : > { %2808 = vmatpush2.bf16.msra.mxu1 %v4095_v8  ;;  %2768 = vmatprep.subr.bf16.mxu0 %v4096_v9  ;;  %v4150_v9 = vld [vmem:[#allocation7 + $0x400] ss:$16 sps:$4 sm:$0xff]   ;;  %v4203_v60 = vld [vmem:[#allocation7 + $0x704] ss:$16 sps:$4 sm:$0xff]  }
  0x82   : > { %2809 = vmatprep.subr.bf16.mxu1 %v4098_v10  ;;  %v4153_v10 = vld [vmem:[#allocation7 + $0x600] ss:$16 sps:$4 sm:$0xff]   ;;  %v299_v14 = vcombine.low %v291_v5, %v298_v7  ;;  %v300_v15 = vcombine.high %v291_v5, %v298_v7  ;;  %v4206_v63 = vld [vmem:[#allocation7 + $0x8e4] ss:$16 sps:$4 sm:$0xff]  }
  0x83   : > { %v4207_v4 = vld [vmem:[#allocation7 + $0xae0] ss:$16 sps:$4 sm:$0xff]   ;;  %v4212_v5 = vld [vmem:[#allocation7 + $0x8c4] ss:$16 sps:$4 sm:$0xff]  }
  0x84   : > { %2769 = vmatpush2.bf16.msra.mxu0 %v4100_v0  ;;  %v4159_v0 = vld [vmem:[#allocation7 + $0x7e0] ss:$16 sps:$4 sm:$0xff]   ;;  %v312_v18 = vshll.u32 %v299_v14, 16  ;;  %v4215_v7 = vld [vmem:[#allocation7 + $0xac4] ss:$16 sps:$4 sm:$0xff]  }
  0x85   : > { %2810 = vmatpush2.bf16.msra.mxu1 %v4101_v17  ;;  %2770 = vmatprep.subr.bf16.mxu0 %v4102_v19  ;;  %v309_v17 = vshrl.u32 %v299_v14, 16  ;;  %v318_v19 = vshll.u32 %v300_v15, 16  ;;  %v4210_v8 = vld [vmem:[#allocation7 + $0x8c0] ss:$16 sps:$4 sm:$0xff]   ;;  %v325_v14 = vld [vmem:[#allocation2 + $0x8] sm:$0x3c] }
  0x86   : > { %2811 = vmatprep.subr.bf16.mxu1 %v4104_v20  ;;  %v4164_v20 = vld [vmem:[#allocation7 + $0x5c4] ss:$16 sps:$4 sm:$0xff]  }
  0x87   : > { %v311_v22 = vrot.slane %v309_v17, 6  ;;  %v320_v26 = vrot.slane %v318_v19, 7  ;;  %v326_v15 = vld [vmem:[#allocation2 + $0x10] sm:$0x3c] }
  0x88   : > { %2771 = vmatpush2.bf16.msra.mxu0 %v4106_v23  ;;  %v314_v23 = vrot.slane %v312_v18, 7  ;;  %v4216_v19 = vld [vmem:[#allocation7 + $0x8a0] ss:$16 sps:$4 sm:$0xff]  }
  0x89   : > { %2812 = vmatpush2.bf16.msra.mxu1 %v4107_v24  ;;  %2822 = vmatprep.subr.bf16.mxu0 %v4110_v27  ;;  %v4162_v24 = vld [vmem:[#allocation7 + $0x5c0] ss:$16 sps:$4 sm:$0xff]  }
  0x8a   : > { %2863 = vmatprep.subr.bf16.mxu1 %v4113_v28  ;;  %v315_v25 = vor.u32 %v314_v23, %v311_v22  ;;  %v4165_v27 = vld [vmem:[#allocation7 + $0x7c0] ss:$16 sps:$4 sm:$0xff]   ;;  %v4170_v28 = vld [vmem:[#allocation7 + $0x5a4] ss:$16 sps:$4 sm:$0xff]  }
  0x8b   : > { %2773 = vmatmul.mubr.bf16.vlgmr.msra.gmra.mxu0 %v4912_v29  ;;  %v4219_v22 = vld [vmem:[#allocation7 + $0xaa0] ss:$16 sps:$4 sm:$0xff]   ;;  %v4224_v23 = vld [vmem:[#allocation7 + $0x884] ss:$16 sps:$4 sm:$0xff]  }
  0x8c   : > { %2814 = vmatmul.mubr.bf16.vlgmr.msra.gmra.mxu1 %v4915_v30  ;;  %2823 = vmatpush1.bf16.msra.mxu0 %v4108_v33  ;;  %v4173_v33 = vld [vmem:[#allocation7 + $0x7a4] ss:$16 sps:$4 sm:$0xff]  }
  0x8d   : > { %2864 = vmatpush1.bf16.msra.mxu1 %v4111_v34  ;;  %2824 = vmatprep.subr.bf16.mxu0 %v4116_v35  ;;  %v316_v34 = vrot.slane %v315_v25, 2  ;;  %v4168_v35 = vld [vmem:[#allocation7 + $0x5a0] ss:$16 sps:$4 sm:$0xff]  }
  0x8e   : > { %2865 = vmatprep.subr.bf16.mxu1 %v4119_v36 }
  0x8f   : > { %v321_v36 = vsel %vm307_vm7, %v316_v34, %v320_v26  ;;  %v4225_v34 = vld [vmem:[#allocation7 + $0xa80] ss:$16 sps:$4 sm:$0xff]  }
  0x90   : > { %2825 = vmatpush1.bf16.msra.mxu0 %v4114_v37  ;;  %v4171_v37 = vld [vmem:[#allocation7 + $0x7a0] ss:$16 sps:$4 sm:$0xff]  }
  0x91   : > { %2866 = vmatpush1.bf16.msra.mxu1 %v4117_v38  ;;  %2826 = vmatprep.subr.bf16.mxu0 %v4122_v39  ;;  %v4176_v38 = vld [vmem:[#allocation7 + $0x584] ss:$16 sps:$4 sm:$0xff]   ;;  %v4941_v39 = vrot.slane %v321_v36, %v4907_v13 }
  0x92   : > { %2867 = vmatprep.subr.bf16.mxu1 %v4125_v40  ;;  %v774_v40 = vcombine.high %v321_v36, %v321_v36  ;;  %v4233_v36 = vld [vmem:[#allocation7 + $0xa64] ss:$16 sps:$4 sm:$0xff]  }
  0x94   : > { %2827 = vmatpush1.bf16.msra.mxu0 %v4120_v41  ;;  %v4179_v41 = vld [vmem:[#allocation7 + $0x784] ss:$16 sps:$4 sm:$0xff]  }
  0x95   : > { %2868 = vmatpush1.bf16.msra.mxu1 %v4123_v42  ;;  %2828 = vmatprep.subr.bf16.mxu0 %v4128_v43  ;;  %v4945_v42 = vcombine.high %v4941_v39, %v4941_v39  ;;  %v4948_v43 = vrot.slane %v774_v40, %v4907_v13 }
  0x96   : > { %2869 = vmatprep.subr.bf16.mxu1 %v4131_v44  ;;  %v4174_v44 = vld [vmem:[#allocation7 + $0x580] ss:$16 sps:$4 sm:$0xff]  }
  0x97   : > { %2854 = vmatprep.mubr.bf16.mxu0 %v4945_v42 }
  0x98   : > { %2829 = vmatpush1.bf16.msra.mxu0 %v4126_v45  ;;  %v4177_v45 = vld [vmem:[#allocation7 + $0x780] ss:$16 sps:$4 sm:$0xff]  }
  0x99   : > { %2870 = vmatpush1.bf16.msra.mxu1 %v4129_v46  ;;  %2830 = vmatprep.subr.bf16.mxu0 %v4134_v47  ;;  %v4182_v46 = vld [vmem:[#allocation7 + $0x564] ss:$16 sps:$4 sm:$0xff]   ;;  %v4952_v47 = vcombine.high %v4948_v43, %v4948_v43 }
  0x9a   : > { %2871 = vmatprep.subr.bf16.mxu1 %v4137_v48  ;;  %v4185_v48 = vld [vmem:[#allocation7 + $0x764] ss:$16 sps:$4 sm:$0xff]  }
  0x9b   : > { %2895 = vmatprep.mubr.bf16.mxu1 %v4952_v47 }
  0x9c   : > { %2831 = vmatpush1.bf16.msra.mxu0 %v4132_v49  ;;  %v4180_v49 = vld [vmem:[#allocation7 + $0x560] ss:$16 sps:$4 sm:$0xff]  }
  0x9d   : > { %2872 = vmatpush1.bf16.msra.mxu1 %v4135_v50  ;;  %2832 = vmatprep.subr.bf16.mxu0 %v4140_v51  ;;  %v4183_v50 = vld [vmem:[#allocation7 + $0x760] ss:$16 sps:$4 sm:$0xff]   ;;  %v4188_v51 = vld [vmem:[#allocation7 + $0x544] ss:$16 sps:$4 sm:$0xff]  }
  0x9e   : > { %2873 = vmatprep.subr.bf16.mxu1 %v4143_v52  ;;  %v4191_v52 = vld [vmem:[#allocation7 + $0x744] ss:$16 sps:$4 sm:$0xff]  }
  0xa0   : > { %2833 = vmatpush1.bf16.msra.mxu0 %v4138_v53  ;;  %v4186_v53 = vld [vmem:[#allocation7 + $0x540] ss:$16 sps:$4 sm:$0xff]  }
  0xa1   : > { %2874 = vmatpush1.bf16.msra.mxu1 %v4141_v54  ;;  %2834 = vmatprep.subr.bf16.mxu0 %v4146_v55  ;;  %v4189_v54 = vld [vmem:[#allocation7 + $0x740] ss:$16 sps:$4 sm:$0xff]   ;;  %v4194_v55 = vld [vmem:[#allocation7 + $0x524] ss:$16 sps:$4 sm:$0xff]  }
  0xa2   : > { %2875 = vmatprep.subr.bf16.mxu1 %v4149_v56  ;;  %v4197_v56 = vld [vmem:[#allocation7 + $0x724] ss:$16 sps:$4 sm:$0xff]  }
  0xa4   : > { %2835 = vmatpush1.bf16.msra.mxu0 %v4144_v57  ;;  %v4192_v57 = vld [vmem:[#allocation7 + $0x520] ss:$16 sps:$4 sm:$0xff]  }
  0xa5   : > { %2876 = vmatpush1.bf16.msra.mxu1 %v4147_v58  ;;  %2836 = vmatprep.subr.bf16.mxu0 %v4152_v2  ;;  %v4195_v58 = vld [vmem:[#allocation7 + $0x720] ss:$16 sps:$4 sm:$0xff]   ;;  %v4209_v2 = vld [vmem:[#allocation7 + $0xae4] ss:$16 sps:$4 sm:$0xff]  }
  0xa6   : > { %2877 = vmatprep.subr.bf16.mxu1 %v4155_v3  ;;  %v4204_v3 = vld [vmem:[#allocation7 + $0x8e0] ss:$16 sps:$4 sm:$0xff]  }
  0xa8   : > { %2837 = vmatpush1.bf16.msra.mxu0 %v4150_v9  ;;  %v4213_v9 = vld [vmem:[#allocation7 + $0xac0] ss:$16 sps:$4 sm:$0xff]  }
  0xa9   : > { %2878 = vmatpush1.bf16.msra.mxu1 %v4153_v10  ;;  %2838 = vmatprep.subr.bf16.mxu0 %v4158_v11  ;;  %v4218_v10 = vld [vmem:[#allocation7 + $0x8a4] ss:$16 sps:$4 sm:$0xff]  }
  0xaa   : > { %2879 = vmatprep.subr.bf16.mxu1 %v4161_v12  ;;  %v324_v11 = vld [vmem:[#allocation2] sm:$0x3c] }
  0xab   : > { %v3543_v17 = vpack.c.bf16 %v325_v14, %v324_v11  ;;  %v4267_v11 = vld [vmem:[#allocation7 + $0xba0] ss:$16 sps:$4 sm:$0xff]   ;;  %v4272_v12 = vld [vmem:[#allocation7 + $0x984] ss:$16 sps:$4 sm:$0xff]  }
  0xac   : > { %2839 = vmatpush2.bf16.msra.mxu0 %v4156_v16  ;;  %v327_v16 = vld [vmem:[#allocation2 + $0x18] sm:$0x3c]  ;;  %v4275_v14 = vld [vmem:[#allocation7 + $0xb84] ss:$16 sps:$4 sm:$0xff]  }
  0xad   : > { %2880 = vmatpush2.bf16.msra.mxu1 %v4159_v0  ;;  %2840 = vmatprep.subr.bf16.mxu0 %v4164_v20  ;;  %v4221_v0 = vld [vmem:[#allocation7 + $0xaa4] ss:$16 sps:$4 sm:$0xff]   ;;  %v3544_v18 = vpack.c.bf16 %v327_v16, %v326_v15  ;;  %v344_v20 = vrot.slane %v3543_v17, %v4907_v13  ;;  %v4270_v15 = vld [vmem:[#allocation7 + $0x980] ss:$16 sps:$4 sm:$0xff]  }
  0xae   : > { %2881 = vmatprep.subr.bf16.mxu1 %v4167_v21  ;;  %v4273_v16 = vld [vmem:[#allocation7 + $0xb80] ss:$16 sps:$4 sm:$0xff]   ;;  %v4281_v17 = vld [vmem:[#allocation7 + $0xb64] ss:$16 sps:$4 sm:$0xff]  }
  0xaf   : > { %v351_v21 = vrot.slane %v3544_v18, %v4907_v13  ;;  %v4276_v18 = vld [vmem:[#allocation7 + $0x960] ss:$16 sps:$4 sm:$0xff]  }
  0xb0   : > { %2841 = vmatpush2.bf16.msra.mxu0 %v4162_v24  ;;  %v4227_v24 = vld [vmem:[#allocation7 + $0xa84] ss:$16 sps:$4 sm:$0xff]  }
  0xb1   : > { %2882 = vmatpush2.bf16.msra.mxu1 %v4165_v27  ;;  %2842 = vmatprep.subr.bf16.mxu0 %v4170_v28  ;;  %v352_v25 = vcombine.low %v344_v20, %v351_v21  ;;  %v353_v26 = vcombine.high %v344_v20, %v351_v21  ;;  %v4222_v27 = vld [vmem:[#allocation7 + $0x880] ss:$16 sps:$4 sm:$0xff]   ;;  %v4284_v20 = vld [vmem:[#allocation7 + $0x944] ss:$16 sps:$4 sm:$0xff]  }
  0xb2   : > { %2883 = vmatprep.subr.bf16.mxu1 %v4173_v33  ;;  %v4287_v21 = vld [vmem:[#allocation7 + $0xb44] ss:$16 sps:$4 sm:$0xff]  }
  0xb3   : > { %v3545_v28 = vrot.slane %v352_v25, 9  ;;  %v363_v33 = vrot.slane %v353_v26, 7  ;;  %v4293_v25 = vld [vmem:[#allocation7 + $0xb24] ss:$16 sps:$4 sm:$0xff]   ;;  %v4288_v26 = vld [vmem:[#allocation7 + $0x920] ss:$16 sps:$4 sm:$0xff]  }
  0xb4   : > { %2843 = vmatpush2.bf16.msra.mxu0 %v4168_v35  ;;  %v4230_v35 = vld [vmem:[#allocation7 + $0x864] ss:$16 sps:$4 sm:$0xff]  }
  0xb5   : > { %2884 = vmatpush2.bf16.msra.mxu1 %v4171_v37  ;;  %2844 = vmatprep.subr.bf16.mxu0 %v4176_v38  ;;  %v364_v37 = vsel %vm360_vm14, %v3545_v28, %v363_v33  ;;  %v4296_v28 = vld [vmem:[#allocation7 + $0x904] ss:$16 sps:$4 sm:$0xff]  }
  0xb6   : > { %2885 = vmatprep.subr.bf16.mxu1 %v4179_v41  ;;  %v4968_v38 = vrot.slane %v364_v37, %v4907_v13  ;;  %v791_v40 = vcombine.high %v364_v37, %v364_v37  ;;  %v4228_v41 = vld [vmem:[#allocation7 + $0x860] ss:$16 sps:$4 sm:$0xff]   ;;  %v4299_v33 = vld [vmem:[#allocation7 + $0xb04] ss:$16 sps:$4 sm:$0xff]   ;;  %v4305_v37 = vld [vmem:[#allocation7 + $0x2ec] ss:$16 sps:$4 sm:$0xff]  }
  0xb8   : > { %2845 = vmatpush2.bf16.msra.mxu0 %v4174_v44  ;;  %v4231_v44 = vld [vmem:[#allocation7 + $0xa60] ss:$16 sps:$4 sm:$0xff]  }
  0xb9   : > { %2886 = vmatpush2.bf16.msra.mxu1 %v4177_v45  ;;  %2846 = vmatprep.subr.bf16.mxu0 %v4182_v46  ;;  %v4972_v45 = vcombine.high %v4968_v38, %v4968_v38  ;;  %v4975_v46 = vrot.slane %v791_v40, %v4907_v13  ;;  %v4300_v40 = vld [vmem:[#allocation7 + $0xe8] ss:$16 sps:$4 sm:$0xff]  }
  0xba   : > { %2887 = vmatprep.subr.bf16.mxu1 %v4185_v48  ;;  %v4236_v48 = vld [vmem:[#allocation7 + $0x844] ss:$16 sps:$4 sm:$0xff]  }
  0xbc   : > { %2847 = vmatpush2.bf16.msra.mxu0 %v4180_v49  ;;  %v4239_v49 = vld [vmem:[#allocation7 + $0xa44] ss:$16 sps:$4 sm:$0xff]  }
  0xbd   : > { %2888 = vmatpush2.bf16.msra.mxu1 %v4183_v50  ;;  %2848 = vmatprep.subr.bf16.mxu0 %v4188_v51  ;;  %v4980_v50 = vcombine.high %v4975_v46, %v4975_v46  ;;  %v4234_v51 = vld [vmem:[#allocation7 + $0x840] ss:$16 sps:$4 sm:$0xff]  }
  0xbe   : > { %2889 = vmatprep.subr.bf16.mxu1 %v4191_v52  ;;  %v4237_v52 = vld [vmem:[#allocation7 + $0xa40] ss:$16 sps:$4 sm:$0xff]  }
  0xc0   : > { %2849 = vmatpush2.bf16.msra.mxu0 %v4186_v53  ;;  %v4242_v53 = vld [vmem:[#allocation7 + $0x824] ss:$16 sps:$4 sm:$0xff]  }
  0xc1   : > { %2890 = vmatpush2.bf16.msra.mxu1 %v4189_v54  ;;  %2850 = vmatprep.subr.bf16.mxu0 %v4194_v55  ;;  %v4245_v54 = vld [vmem:[#allocation7 + $0xa24] ss:$16 sps:$4 sm:$0xff]   ;;  %v4240_v55 = vld [vmem:[#allocation7 + $0x820] ss:$16 sps:$4 sm:$0xff]  }
  0xc2   : > { %2891 = vmatprep.subr.bf16.mxu1 %v4197_v56  ;;  %v4243_v56 = vld [vmem:[#allocation7 + $0xa20] ss:$16 sps:$4 sm:$0xff]  }
  0xc4   : > { %2851 = vmatpush2.bf16.msra.mxu0 %v4192_v57  ;;  %v4248_v57 = vld [vmem:[#allocation7 + $0x804] ss:$16 sps:$4 sm:$0xff]  }
  0xc5   : > { %2892 = vmatpush2.bf16.msra.mxu1 %v4195_v58  ;;  %2852 = vmatprep.subr.bf16.mxu0 %v4200_v59  ;;  %v4251_v58 = vld [vmem:[#allocation7 + $0xa04] ss:$16 sps:$4 sm:$0xff]   ;;  %v4246_v59 = vld [vmem:[#allocation7 + $0x800] ss:$16 sps:$4 sm:$0xff]  }
  0xc6   : > { %2893 = vmatprep.subr.bf16.mxu1 %v4203_v60  ;;  %v4249_v60 = vld [vmem:[#allocation7 + $0xa00] ss:$16 sps:$4 sm:$0xff]  }
  0xc8   : > { %2853 = vmatpush2.bf16.msra.mxu0 %v4198_v61  ;;  %v4254_v61 = vld [vmem:[#allocation7 + $0x9e4] ss:$16 sps:$4 sm:$0xff]  }
  0xc9   : > { %2894 = vmatpush2.bf16.msra.mxu1 %v4201_v62  ;;  %2904 = vmatprep.subr.bf16.mxu0 %v4206_v63  ;;  %v4257_v62 = vld [vmem:[#allocation7 + $0xbe4] ss:$16 sps:$4 sm:$0xff]   ;;  %v4252_v63 = vld [vmem:[#allocation7 + $0x9e0] ss:$16 sps:$4 sm:$0xff]  }
  0xca   : > { %2945 = vmatprep.subr.bf16.mxu1 %v4209_v2  ;;  %v4255_v2 = vld [vmem:[#allocation7 + $0xbe0] ss:$16 sps:$4 sm:$0xff]  }
  0xcb   : > { %2855 = vmatmul.mubr.bf16.vlgmr.msra.gmra.mxu0 %v4941_v39 }
  0xcc   : > { %2896 = vmatmul.mubr.bf16.vlgmr.msra.gmra.mxu1 %v4948_v43  ;;  %2905 = vmatpush1.bf16.msra.mxu0 %v4204_v3  ;;  %v4260_v3 = vld [vmem:[#allocation7 + $0x9c4] ss:$16 sps:$4 sm:$0xff]  }
  0xcd   : > { %2946 = vmatpush1.bf16.msra.mxu1 %v4207_v4  ;;  %2906 = vmatprep.subr.bf16.mxu0 %v4212_v5  ;;  %v4263_v4 = vld [vmem:[#allocation7 + $0xbc4] ss:$16 sps:$4 sm:$0xff]   ;;  %v4258_v5 = vld [vmem:[#allocation7 + $0x9c0] ss:$16 sps:$4 sm:$0xff]  }
  0xce   : > { %2947 = vmatprep.subr.bf16.mxu1 %v4215_v7  ;;  %2936 = vmatprep.mubr.bf16.mxu0 %v4972_v45  ;;  %v4261_v7 = vld [vmem:[#allocation7 + $0xbc0] ss:$16 sps:$4 sm:$0xff]  }
  0xcf   : > { %2977 = vmatprep.mubr.bf16.mxu1 %v4980_v50 }
  0xd0   : > { %2907 = vmatpush1.bf16.msra.mxu0 %v4210_v8  ;;  %v4266_v8 = vld [vmem:[#allocation7 + $0x9a4] ss:$16 sps:$4 sm:$0xff]  }
  0xd1   : > { %2948 = vmatpush1.bf16.msra.mxu1 %v4213_v9  ;;  %2908 = vmatprep.subr.bf16.mxu0 %v4218_v10  ;;  %v4269_v9 = vld [vmem:[#allocation7 + $0xba4] ss:$16 sps:$4 sm:$0xff]   ;;  %v4264_v10 = vld [vmem:[#allocation7 + $0x9a0] ss:$16 sps:$4 sm:$0xff]  }
  0xd2   : > { %2949 = vmatprep.subr.bf16.mxu1 %v4221_v0  ;;  %v4278_v0 = vld [vmem:[#allocation7 + $0x964] ss:$16 sps:$4 sm:$0xff]  }
  0xd4   : > { %2909 = vmatpush1.bf16.msra.mxu0 %v4216_v19  ;;  %v4279_v19 = vld [vmem:[#allocation7 + $0xb60] ss:$16 sps:$4 sm:$0xff]  }
  0xd5   : > { %2950 = vmatpush1.bf16.msra.mxu1 %v4219_v22  ;;  %2910 = vmatprep.subr.bf16.mxu0 %v4224_v23  ;;  %v4282_v22 = vld [vmem:[#allocation7 + $0x940] ss:$16 sps:$4 sm:$0xff]  }
  0xd6   : > { %2951 = vmatprep.subr.bf16.mxu1 %v4227_v24  ;;  %v4285_v23 = vld [vmem:[#allocation7 + $0xb40] ss:$16 sps:$4 sm:$0xff]   ;;  %v4290_v24 = vld [vmem:[#allocation7 + $0x924] ss:$16 sps:$4 sm:$0xff]  }
  0xd8   : > { %2911 = vmatpush1.bf16.msra.mxu0 %v4222_v27  ;;  %v4291_v27 = vld [vmem:[#allocation7 + $0xb20] ss:$16 sps:$4 sm:$0xff]  }
  0xd9   : > { %2952 = vmatpush1.bf16.msra.mxu1 %v4225_v34  ;;  %2912 = vmatprep.subr.bf16.mxu0 %v4230_v35  ;;  %v4294_v34 = vld [vmem:[#allocation7 + $0x900] ss:$16 sps:$4 sm:$0xff]  }
  0xda   : > { %2953 = vmatprep.subr.bf16.mxu1 %v4233_v36  ;;  %v4297_v35 = vld [vmem:[#allocation7 + $0xb00] ss:$16 sps:$4 sm:$0xff]   ;;  %v4302_v36 = vld [vmem:[#allocation7 + $0xec] ss:$16 sps:$4 sm:$0xff]  }
  0xdc   : > { %2913 = vmatpush1.bf16.msra.mxu0 %v4228_v41  ;;  %v4303_v41 = vld [vmem:[#allocation7 + $0x2e8] ss:$16 sps:$4 sm:$0xff]  }
  0xdd   : > { %2954 = vmatpush1.bf16.msra.mxu1 %v4231_v44  ;;  %2914 = vmatprep.subr.bf16.mxu0 %v4236_v48  ;;  %v4308_v44 = vld [vmem:[#allocation7 + $0xcc] ss:$16 sps:$4 sm:$0xff]  }
  0xde   : > { %2955 = vmatprep.subr.bf16.mxu1 %v4239_v49  ;;  %v4311_v48 = vld [vmem:[#allocation7 + $0x2cc] ss:$16 sps:$4 sm:$0xff]   ;;  %v4306_v49 = vld [vmem:[#allocation7 + $0xc8] ss:$16 sps:$4 sm:$0xff]  }
  0xe0   : > { %2915 = vmatpush1.bf16.msra.mxu0 %v4234_v51  ;;  %v4309_v51 = vld [vmem:[#allocation7 + $0x2c8] ss:$16 sps:$4 sm:$0xff]  }
  0xe1   : > { %2956 = vmatpush1.bf16.msra.mxu1 %v4237_v52  ;;  %2916 = vmatprep.subr.bf16.mxu0 %v4242_v53  ;;  %v4314_v52 = vld [vmem:[#allocation7 + $0xac] ss:$16 sps:$4 sm:$0xff]  }
  0xe2   : > { %2957 = vmatprep.subr.bf16.mxu1 %v4245_v54  ;;  %v4317_v53 = vld [vmem:[#allocation7 + $0x2ac] ss:$16 sps:$4 sm:$0xff]   ;;  %v4312_v54 = vld [vmem:[#allocation7 + $0xa8] ss:$16 sps:$4 sm:$0xff]  }
  0xe4   : > { %2917 = vmatpush1.bf16.msra.mxu0 %v4240_v55  ;;  %v4315_v55 = vld [vmem:[#allocation7 + $0x2a8] ss:$16 sps:$4 sm:$0xff]  }
  0xe5   : > { %2958 = vmatpush1.bf16.msra.mxu1 %v4243_v56  ;;  %2918 = vmatprep.subr.bf16.mxu0 %v4248_v57  ;;  %v4320_v56 = vld [vmem:[#allocation7 + $0x8c] ss:$16 sps:$4 sm:$0xff]  }
  0xe6   : > { %2959 = vmatprep.subr.bf16.mxu1 %v4251_v58  ;;  %v4323_v57 = vld [vmem:[#allocation7 + $0x28c] ss:$16 sps:$4 sm:$0xff]   ;;  %v4318_v58 = vld [vmem:[#allocation7 + $0x88] ss:$16 sps:$4 sm:$0xff]  }
  0xe8   : > { %2919 = vmatpush1.bf16.msra.mxu0 %v4246_v59  ;;  %v4321_v59 = vld [vmem:[#allocation7 + $0x288] ss:$16 sps:$4 sm:$0xff]  }
  0xe9   : > { %2960 = vmatpush1.bf16.msra.mxu1 %v4249_v60  ;;  %2920 = vmatprep.subr.bf16.mxu0 %v4254_v61  ;;  %v4326_v60 = vld [vmem:[#allocation7 + $0x6c] ss:$16 sps:$4 sm:$0xff]  }
  0xea   : > { %2961 = vmatprep.subr.bf16.mxu1 %v4257_v62  ;;  %v4329_v61 = vld [vmem:[#allocation7 + $0x26c] ss:$16 sps:$4 sm:$0xff]   ;;  %v4324_v62 = vld [vmem:[#allocation7 + $0x68] ss:$16 sps:$4 sm:$0xff]  }
  0xec   : > { %2921 = vmatpush2.bf16.msra.mxu0 %v4252_v63  ;;  %v4335_v63 = vld [vmem:[#allocation7 + $0x24c] ss:$16 sps:$4 sm:$0xff]  }
  0xed   : > { %2962 = vmatpush2.bf16.msra.mxu1 %v4255_v2  ;;  %2922 = vmatprep.subr.bf16.mxu0 %v4260_v3  ;;  %v4330_v2 = vld [vmem:[#allocation7 + $0x48] ss:$16 sps:$4 sm:$0xff]  }
  0xee   : > { %2963 = vmatprep.subr.bf16.mxu1 %v4263_v4  ;;  %v4333_v3 = vld [vmem:[#allocation7 + $0x248] ss:$16 sps:$4 sm:$0xff]   ;;  %v4338_v4 = vld [vmem:[#allocation7 + $0x2c] ss:$16 sps:$4 sm:$0xff]  }
  0xf0   : > { %2923 = vmatpush2.bf16.msra.mxu0 %v4258_v5  ;;  %v4341_v5 = vld [vmem:[#allocation7 + $0x22c] ss:$16 sps:$4 sm:$0xff]  }
  0xf1   : > { %2964 = vmatpush2.bf16.msra.mxu1 %v4261_v7  ;;  %2924 = vmatprep.subr.bf16.mxu0 %v4266_v8  ;;  %v4336_v7 = vld [vmem:[#allocation7 + $0x28] ss:$16 sps:$4 sm:$0xff]  }
  0xf2   : > { %2965 = vmatprep.subr.bf16.mxu1 %v4269_v9  ;;  %v4339_v8 = vld [vmem:[#allocation7 + $0x228] ss:$16 sps:$4 sm:$0xff]   ;;  %v4344_v9 = vld [vmem:[#allocation7 + $0xc] ss:$16 sps:$4 sm:$0xff]  }
  0xf4   : > { %2925 = vmatpush2.bf16.msra.mxu0 %v4264_v10  ;;  %v4347_v10 = vld [vmem:[#allocation7 + $0x20c] ss:$16 sps:$4 sm:$0xff]  }
  0xf5   : > { %2966 = vmatpush2.bf16.msra.mxu1 %v4267_v11  ;;  %2926 = vmatprep.subr.bf16.mxu0 %v4272_v12  ;;  %v4342_v11 = vld [vmem:[#allocation7 + $0x8] ss:$16 sps:$4 sm:$0xff]  }
  0xf6   : > { %2967 = vmatprep.subr.bf16.mxu1 %v4275_v14  ;;  %v4345_v12 = vld [vmem:[#allocation7 + $0x208] ss:$16 sps:$4 sm:$0xff]   ;;  %v4350_v14 = vld [vmem:[#allocation7 + $0x1ec] ss:$16 sps:$4 sm:$0xff]  }
  0xf8   : > { %2927 = vmatpush2.bf16.msra.mxu0 %v4270_v15  ;;  %v4353_v15 = vld [vmem:[#allocation7 + $0x3ec] ss:$16 sps:$4 sm:$0xff]  }
  0xf9   : > { %2968 = vmatpush2.bf16.msra.mxu1 %v4273_v16  ;;  %2928 = vmatprep.subr.bf16.mxu0 %v4278_v0  ;;  %v4348_v16 = vld [vmem:[#allocation7 + $0x1e8] ss:$16 sps:$4 sm:$0xff]  }
  0xfa   : > { %2969 = vmatprep.subr.bf16.mxu1 %v4281_v17  ;;  %v4351_v0 = vld [vmem:[#allocation7 + $0x3e8] ss:$16 sps:$4 sm:$0xff]   ;;  %v4356_v17 = vld [vmem:[#allocation7 + $0x1cc] ss:$16 sps:$4 sm:$0xff]  }
  0xfc   : > { %2929 = vmatpush2.bf16.msra.mxu0 %v4276_v18  ;;  %v4359_v18 = vld [vmem:[#allocation7 + $0x3cc] ss:$16 sps:$4 sm:$0xff]  }
  0xfd   : > { %2970 = vmatpush2.bf16.msra.mxu1 %v4279_v19  ;;  %2930 = vmatprep.subr.bf16.mxu0 %v4284_v20  ;;  %v4354_v19 = vld [vmem:[#allocation7 + $0x1c8] ss:$16 sps:$4 sm:$0xff]  }
  0xfe   : > { %2971 = vmatprep.subr.bf16.mxu1 %v4287_v21  ;;  %v4357_v20 = vld [vmem:[#allocation7 + $0x3c8] ss:$16 sps:$4 sm:$0xff]   ;;  %v4362_v21 = vld [vmem:[#allocation7 + $0x1ac] ss:$16 sps:$4 sm:$0xff]  }
 0x100   : > { %2931 = vmatpush2.bf16.msra.mxu0 %v4282_v22  ;;  %v4365_v22 = vld [vmem:[#allocation7 + $0x3ac] ss:$16 sps:$4 sm:$0xff]  }
 0x101   : > { %2972 = vmatpush2.bf16.msra.mxu1 %v4285_v23  ;;  %2932 = vmatprep.subr.bf16.mxu0 %v4290_v24  ;;  %v4360_v23 = vld [vmem:[#allocation7 + $0x1a8] ss:$16 sps:$4 sm:$0xff]  }
 0x102   : > { %2973 = vmatprep.subr.bf16.mxu1 %v4293_v25  ;;  %v4363_v24 = vld [vmem:[#allocation7 + $0x3a8] ss:$16 sps:$4 sm:$0xff]   ;;  %v4368_v25 = vld [vmem:[#allocation7 + $0x18c] ss:$16 sps:$4 sm:$0xff]  }
 0x104   : > { %2933 = vmatpush2.bf16.msra.mxu0 %v4288_v26  ;;  %v4371_v26 = vld [vmem:[#allocation7 + $0x38c] ss:$16 sps:$4 sm:$0xff]  }
 0x105   : > { %2974 = vmatpush2.bf16.msra.mxu1 %v4291_v27  ;;  %2934 = vmatprep.subr.bf16.mxu0 %v4296_v28  ;;  %v4366_v27 = vld [vmem:[#allocation7 + $0x188] ss:$16 sps:$4 sm:$0xff]  }
 0x106   : > { %2975 = vmatprep.subr.bf16.mxu1 %v4299_v33  ;;  %v4369_v28 = vld [vmem:[#allocation7 + $0x388] ss:$16 sps:$4 sm:$0xff]   ;;  %v4374_v33 = vld [vmem:[#allocation7 + $0x16c] ss:$16 sps:$4 sm:$0xff]  }
 0x108   : > { %2935 = vmatpush2.bf16.msra.mxu0 %v4294_v34  ;;  %v4377_v34 = vld [vmem:[#allocation7 + $0x36c] ss:$16 sps:$4 sm:$0xff]  }
 0x109   : > { %2976 = vmatpush2.bf16.msra.mxu1 %v4297_v35  ;;  %2986 = vmatprep.subr.bf16.mxu0 %v4302_v36  ;;  %v4372_v35 = vld [vmem:[#allocation7 + $0x168] ss:$16 sps:$4 sm:$0xff]  }
 0x10a   : > { %3027 = vmatprep.subr.bf16.mxu1 %v4305_v37  ;;  %v4375_v36 = vld [vmem:[#allocation7 + $0x368] ss:$16 sps:$4 sm:$0xff]   ;;  %v4380_v37 = vld [vmem:[#allocation7 + $0x14c] ss:$16 sps:$4 sm:$0xff]  }
 0x10b   : > { %2937 = vmatmul.mubr.bf16.vlgmr.msra.gmra.mxu0 %v4968_v38 }
 0x10c   : > { %2978 = vmatmul.mubr.bf16.vlgmr.msra.gmra.mxu1 %v4975_v46  ;;  %2987 = vmatpush1.bf16.msra.mxu0 %v4300_v40  ;;  %v4383_v40 = vld [vmem:[#allocation7 + $0x34c] ss:$16 sps:$4 sm:$0xff]  }
 0x10d   : > { %3028 = vmatpush1.bf16.msra.mxu1 %v4303_v41  ;;  %2988 = vmatprep.subr.bf16.mxu0 %v4308_v44  ;;  %v4378_v41 = vld [vmem:[#allocation7 + $0x148] ss:$16 sps:$4 sm:$0xff]  }
 0x10e   : > { %3029 = vmatprep.subr.bf16.mxu1 %v4311_v48  ;;  %3018 = vmatprep.mubr.bf16.mxu0 %v4919_v31  ;;  %v4327_v31 = vld [vmem:[#allocation7 + $0x268] ss:$16 sps:$4 sm:$0xff]   ;;  %v4386_v48 = vld [vmem:[#allocation7 + $0x12c] ss:$16 sps:$4 sm:$0xff]  }
 0x10f   : > { %3059 = vmatprep.mubr.bf16.mxu1 %v4923_v32  ;;  %v4332_v32 = vld [vmem:[#allocation7 + $0x4c] ss:$16 sps:$4 sm:$0xff]   ;;  %v4381_v44 = vld [vmem:[#allocation7 + $0x348] ss:$16 sps:$4 sm:$0xff]  }
 0x110   : > { %2989 = vmatpush1.bf16.msra.mxu0 %v4306_v49  ;;  %v4389_v49 = vld [vmem:[#allocation7 + $0x32c] ss:$16 sps:$4 sm:$0xff]  }
 0x111   : > { %3030 = vmatpush1.bf16.msra.mxu1 %v4309_v51  ;;  %2990 = vmatprep.subr.bf16.mxu0 %v4314_v52  ;;  %v4384_v51 = vld [vmem:[#allocation7 + $0x128] ss:$16 sps:$4 sm:$0xff]  }
 0x112   : > { %3031 = vmatprep.subr.bf16.mxu1 %v4317_v53  ;;  %v4387_v52 = vld [vmem:[#allocation7 + $0x328] ss:$16 sps:$4 sm:$0xff]   ;;  %v4392_v53 = vld [vmem:[#allocation7 + $0x10c] ss:$16 sps:$4 sm:$0xff]  }
 0x114   : > { %2991 = vmatpush1.bf16.msra.mxu0 %v4312_v54  ;;  %v4395_v54 = vld [vmem:[#allocation7 + $0x30c] ss:$16 sps:$4 sm:$0xff]  }
 0x115   : > { %3032 = vmatpush1.bf16.msra.mxu1 %v4315_v55  ;;  %2992 = vmatprep.subr.bf16.mxu0 %v4320_v56  ;;  %v4390_v55 = vld [vmem:[#allocation7 + $0x108] ss:$16 sps:$4 sm:$0xff]  }
 0x116   : > { %3033 = vmatprep.subr.bf16.mxu1 %v4323_v57  ;;  %v4393_v56 = vld [vmem:[#allocation7 + $0x308] ss:$16 sps:$4 sm:$0xff]   ;;  %v4398_v57 = vld [vmem:[#allocation7 + $0x4ec] ss:$16 sps:$4 sm:$0xff]  }
 0x118   : > { %2993 = vmatpush1.bf16.msra.mxu0 %v4318_v58  ;;  %v4401_v58 = vld [vmem:[#allocation7 + $0x6ec] ss:$16 sps:$4 sm:$0xff]  }
 0x119   : > { %3034 = vmatpush1.bf16.msra.mxu1 %v4321_v59  ;;  %2994 = vmatprep.subr.bf16.mxu0 %v4326_v60  ;;  %v4396_v59 = vld [vmem:[#allocation7 + $0x4e8] ss:$16 sps:$4 sm:$0xff]  }
 0x11a   : > { %3035 = vmatprep.subr.bf16.mxu1 %v4329_v61  ;;  %v4399_v60 = vld [vmem:[#allocation7 + $0x6e8] ss:$16 sps:$4 sm:$0xff]   ;;  %v4404_v61 = vld [vmem:[#allocation7 + $0x4cc] ss:$16 sps:$4 sm:$0xff]  }
 0x11c   : > { %2995 = vmatpush1.bf16.msra.mxu0 %v4324_v62  ;;  %v4407_v62 = vld [vmem:[#allocation7 + $0x6cc] ss:$16 sps:$4 sm:$0xff]  }
 0x11d   : > { %3036 = vmatpush1.bf16.msra.mxu1 %v4327_v31  ;;  %2996 = vmatprep.subr.bf16.mxu0 %v4332_v32 }
 0x11e   : > { %3037 = vmatprep.subr.bf16.mxu1 %v4335_v63  ;;  %v4402_v63 = vld [vmem:[#allocation7 + $0x4c8] ss:$16 sps:$4 sm:$0xff]  }
 0x120   : > { %2997 = vmatpush1.bf16.msra.mxu0 %v4330_v2 }
 0x121   : > { %3038 = vmatpush1.bf16.msra.mxu1 %v4333_v3  ;;  %2998 = vmatprep.subr.bf16.mxu0 %v4338_v4  ;;  %v4405_v3 = vld [vmem:[#allocation7 + $0x6c8] ss:$16 sps:$4 sm:$0xff]  }
 0x122   : > { %3039 = vmatprep.subr.bf16.mxu1 %v4341_v5 }
 0x124   : > { %2999 = vmatpush1.bf16.msra.mxu0 %v4336_v7  ;;  %v4410_v7 = vld [vmem:[#allocation7 + $0x4ac] ss:$16 sps:$4 sm:$0xff]  }
 0x125   : > { %3040 = vmatpush1.bf16.msra.mxu1 %v4339_v8  ;;  %3000 = vmatprep.subr.bf16.mxu0 %v4344_v9  ;;  %v4413_v8 = vld [vmem:[#allocation7 + $0x6ac] ss:$16 sps:$4 sm:$0xff]  }
 0x126   : > { %3041 = vmatprep.subr.bf16.mxu1 %v4347_v10  ;;  %v4408_v10 = vld [vmem:[#allocation7 + $0x4a8] ss:$16 sps:$4 sm:$0xff]  }
 0x128   : > { %3001 = vmatpush1.bf16.msra.mxu0 %v4342_v11  ;;  %v4411_v11 = vld [vmem:[#allocation7 + $0x6a8] ss:$16 sps:$4 sm:$0xff]  }
 0x129   : > { %3042 = vmatpush1.bf16.msra.mxu1 %v4345_v12  ;;  %3002 = vmatprep.subr.bf16.mxu0 %v4350_v14 }
 0x12a   : > { %3043 = vmatprep.subr.bf16.mxu1 %v4353_v15  ;;  %v4416_v15 = vld [vmem:[#allocation7 + $0x48c] ss:$16 sps:$4 sm:$0xff]  }
 0x12c   : > { %3003 = vmatpush2.bf16.msra.mxu0 %v4348_v16  ;;  %v4419_v16 = vld [vmem:[#allocation7 + $0x68c] ss:$16 sps:$4 sm:$0xff]  }
 0x12d   : > { %3044 = vmatpush2.bf16.msra.mxu1 %v4351_v0  ;;  %3004 = vmatprep.subr.bf16.mxu0 %v4356_v17  ;;  %v4414_v0 = vld [vmem:[#allocation7 + $0x488] ss:$16 sps:$4 sm:$0xff]  }
 0x12e   : > { %3045 = vmatprep.subr.bf16.mxu1 %v4359_v18  ;;  %v4417_v17 = vld [vmem:[#allocation7 + $0x688] ss:$16 sps:$4 sm:$0xff]  }
 0x12f   : > { %v4420_v18 = vld [vmem:[#allocation7 + $0x468] ss:$16 sps:$4 sm:$0xff]  }
 0x130   : > { %3005 = vmatpush2.bf16.msra.mxu0 %v4354_v19  ;;  %v4423_v19 = vld [vmem:[#allocation7 + $0x668] ss:$16 sps:$4 sm:$0xff]  }
 0x131   : > { %3046 = vmatpush2.bf16.msra.mxu1 %v4357_v20  ;;  %3006 = vmatprep.subr.bf16.mxu0 %v4362_v21  ;;  %v4428_v20 = vld [vmem:[#allocation7 + $0x44c] ss:$16 sps:$4 sm:$0xff]  }
 0x132   : > { %3047 = vmatprep.subr.bf16.mxu1 %v4365_v22  ;;  %v4431_v21 = vld [vmem:[#allocation7 + $0x64c] ss:$16 sps:$4 sm:$0xff]   ;;  %v4426_v22 = vld [vmem:[#allocation7 + $0x448] ss:$16 sps:$4 sm:$0xff]  }
 0x134   : > { %3007 = vmatpush2.bf16.msra.mxu0 %v4360_v23  ;;  %v4429_v23 = vld [vmem:[#allocation7 + $0x648] ss:$16 sps:$4 sm:$0xff]  }
 0x135   : > { %3048 = vmatpush2.bf16.msra.mxu1 %v4363_v24  ;;  %3008 = vmatprep.subr.bf16.mxu0 %v4368_v25  ;;  %v4434_v24 = vld [vmem:[#allocation7 + $0x42c] ss:$16 sps:$4 sm:$0xff]  }
 0x136   : > { %3049 = vmatprep.subr.bf16.mxu1 %v4371_v26  ;;  %v4437_v25 = vld [vmem:[#allocation7 + $0x62c] ss:$16 sps:$4 sm:$0xff]   ;;  %v4432_v26 = vld [vmem:[#allocation7 + $0x428] ss:$16 sps:$4 sm:$0xff]  }
 0x138   : > { %3009 = vmatpush2.bf16.msra.mxu0 %v4366_v27  ;;  %v4435_v27 = vld [vmem:[#allocation7 + $0x628] ss:$16 sps:$4 sm:$0xff]  }
 0x139   : > { %3050 = vmatpush2.bf16.msra.mxu1 %v4369_v28  ;;  %3010 = vmatprep.subr.bf16.mxu0 %v4374_v33  ;;  %v4440_v28 = vld [vmem:[#allocation7 + $0x40c] ss:$16 sps:$4 sm:$0xff]  }
 0x13a   : > { %3051 = vmatprep.subr.bf16.mxu1 %v4377_v34  ;;  %v4443_v33 = vld [vmem:[#allocation7 + $0x60c] ss:$16 sps:$4 sm:$0xff]   ;;  %v4438_v34 = vld [vmem:[#allocation7 + $0x408] ss:$16 sps:$4 sm:$0xff]  }
 0x13c   : > { %3011 = vmatpush2.bf16.msra.mxu0 %v4372_v35  ;;  %v4441_v35 = vld [vmem:[#allocation7 + $0x608] ss:$16 sps:$4 sm:$0xff]  }
 0x13d   : > { %3052 = vmatpush2.bf16.msra.mxu1 %v4375_v36  ;;  %3012 = vmatprep.subr.bf16.mxu0 %v4380_v37  ;;  %v4446_v36 = vld [vmem:[#allocation7 + $0x5ec] ss:$16 sps:$4 sm:$0xff]  }
 0x13e   : > { %3053 = vmatprep.subr.bf16.mxu1 %v4383_v40  ;;  %v4449_v37 = vld [vmem:[#allocation7 + $0x7ec] ss:$16 sps:$4 sm:$0xff]   ;;  %v4444_v40 = vld [vmem:[#allocation7 + $0x5e8] ss:$16 sps:$4 sm:$0xff]  }
 0x140   : > { %3013 = vmatpush2.bf16.msra.mxu0 %v4378_v41  ;;  %v4447_v41 = vld [vmem:[#allocation7 + $0x7e8] ss:$16 sps:$4 sm:$0xff]  }
 0x141   : > { %3054 = vmatpush2.bf16.msra.mxu1 %v4381_v44  ;;  %3014 = vmatprep.subr.bf16.mxu0 %v4386_v48  ;;  %v4452_v44 = vld [vmem:[#allocation7 + $0x5cc] ss:$16 sps:$4 sm:$0xff]  }
 0x142   : > { %3055 = vmatprep.subr.bf16.mxu1 %v4389_v49  ;;  %v4455_v48 = vld [vmem:[#allocation7 + $0x7cc] ss:$16 sps:$4 sm:$0xff]   ;;  %v4450_v49 = vld [vmem:[#allocation7 + $0x5c8] ss:$16 sps:$4 sm:$0xff]  }
 0x144   : > { %3015 = vmatpush2.bf16.msra.mxu0 %v4384_v51  ;;  %v4453_v51 = vld [vmem:[#allocation7 + $0x7c8] ss:$16 sps:$4 sm:$0xff]  }
 0x145   : > { %3056 = vmatpush2.bf16.msra.mxu1 %v4387_v52  ;;  %3016 = vmatprep.subr.bf16.mxu0 %v4392_v53  ;;  %v4458_v52 = vld [vmem:[#allocation7 + $0x5ac] ss:$16 sps:$4 sm:$0xff]  }
 0x146   : > { %3057 = vmatprep.subr.bf16.mxu1 %v4395_v54  ;;  %v4461_v53 = vld [vmem:[#allocation7 + $0x7ac] ss:$16 sps:$4 sm:$0xff]   ;;  %v4456_v54 = vld [vmem:[#allocation7 + $0x5a8] ss:$16 sps:$4 sm:$0xff]  }
 0x148   : > { %3017 = vmatpush2.bf16.msra.mxu0 %v4390_v55  ;;  %v4459_v55 = vld [vmem:[#allocation7 + $0x7a8] ss:$16 sps:$4 sm:$0xff]  }
 0x149   : > { %3058 = vmatpush2.bf16.msra.mxu1 %v4393_v56  ;;  %3068 = vmatprep.subr.bf16.mxu0 %v4398_v57  ;;  %v4464_v56 = vld [vmem:[#allocation7 + $0x58c] ss:$16 sps:$4 sm:$0xff]  }
 0x14a   : > { %3109 = vmatprep.subr.bf16.mxu1 %v4401_v58  ;;  %v4467_v57 = vld [vmem:[#allocation7 + $0x78c] ss:$16 sps:$4 sm:$0xff]   ;;  %v4462_v58 = vld [vmem:[#allocation7 + $0x588] ss:$16 sps:$4 sm:$0xff]  }
 0x14b   : > { %v2774_v31 = vpop.f32.mrf.mxu0  ;;  %3019 = vmatmul.mubr.bf16.vlgmr.msra.gmra.mxu0 %v4912_v29 }
 0x14c   : > { %v2815_v32 = vpop.f32.mrf.mxu1  ;;  %3060 = vmatmul.mubr.bf16.vlgmr.msra.gmra.mxu1 %v4915_v30  ;;  %3069 = vmatpush1.bf16.msra.mxu0 %v4396_v59  ;;  %v4465_v59 = vld [vmem:[#allocation7 + $0x788] ss:$16 sps:$4 sm:$0xff]  }
 0x14d   : > { %v4989_v2 = vadd.f32 %v2815_v32, %v2774_v31  ;;  %3110 = vmatpush1.bf16.msra.mxu1 %v4399_v60  ;;  %v2776_v4 = vpop.f32.mrf.mxu0  ;;  %3070 = vmatprep.subr.bf16.mxu0 %v4404_v61  ;;  %v4470_v60 = vld [vmem:[#allocation7 + $0x56c] ss:$16 sps:$4 sm:$0xff]   ;;  %v4471_v31 = vld [vmem:[#allocation7 + $0x768] ss:$16 sps:$4 sm:$0xff]  }
 0x14e   : > { %v2817_v5 = vpop.f32.mrf.mxu1  ;;  %3111 = vmatprep.subr.bf16.mxu1 %v4407_v62  ;;  %3100 = vmatprep.mubr.bf16.mxu0 %v4945_v42  ;;  %v4422_v42 = vld [vmem:[#allocation7 + $0x46c] ss:$16 sps:$4 sm:$0xff]   ;;  %v4468_v62 = vld [vmem:[#allocation7 + $0x568] ss:$16 sps:$4 sm:$0xff]  }
 0x14f   : > { %v4991_v9 = vadd.f32 %v2817_v5, %v2776_v4  ;;  %3141 = vmatprep.mubr.bf16.mxu1 %v4952_v47  ;;  %v2778_v29 = vpop.f32.mrf.mxu0  ;;  %v4425_v47 = vld [vmem:[#allocation7 + $0x66c] ss:$16 sps:$4 sm:$0xff]   ;;  %v4477_v4 = vld [vmem:[#allocation7 + $0x748] ss:$16 sps:$4 sm:$0xff]  }
 0x150   : > { %v2819_v30 = vpop.f32.mrf.mxu1  ;;  %3071 = vmatpush1.bf16.msra.mxu0 %v4402_v63  ;;  %v4473_v61 = vld [vmem:[#allocation7 + $0x76c] ss:$16 sps:$4 sm:$0xff]   ;;  %v4483_v29 = vld [vmem:[#allocation7 + $0x728] ss:$16 sps:$4 sm:$0xff]  }
 0x151   : > { %3112 = vmatpush1.bf16.msra.mxu1 %v4405_v3  ;;  %v2779_v12 = vpop.f32.mrf.mxu0  ;;  %3072 = vmatprep.subr.bf16.mxu0 %v4410_v7  ;;  %v4476_v32 = vld [vmem:[#allocation7 + $0x54c] ss:$16 sps:$4 sm:$0xff]   ;;  %v4474_v3 = vld [vmem:[#allocation7 + $0x548] ss:$16 sps:$4 sm:$0xff]  }
 0x152   : > { %v2820_v14 = vpop.f32.mrf.mxu1  ;;  %3113 = vmatprep.subr.bf16.mxu1 %v4413_v8  ;;  %v4479_v63 = vld [vmem:[#allocation7 + $0x74c] ss:$16 sps:$4 sm:$0xff]   ;;  %v4480_v8 = vld [vmem:[#allocation7 + $0x528] ss:$16 sps:$4 sm:$0xff]  }
 0x153   : > { %v4482_v5 = vld [vmem:[#allocation7 + $0x52c] ss:$16 sps:$4 sm:$0xff]   ;;  %v4489_v12 = vld [vmem:[#allocation7 + $0x708] ss:$16 sps:$4 sm:$0xff]  }
 0x154   : > { %3073 = vmatpush1.bf16.msra.mxu0 %v4408_v10  ;;  %v4485_v7 = vld [vmem:[#allocation7 + $0x72c] ss:$16 sps:$4 sm:$0xff]  }
 0x155   : > { %3114 = vmatpush1.bf16.msra.mxu1 %v4411_v11  ;;  %3074 = vmatprep.subr.bf16.mxu0 %v4416_v15  ;;  %v4488_v30 = vld [vmem:[#allocation7 + $0x50c] ss:$16 sps:$4 sm:$0xff]   ;;  %v4486_v11 = vld [vmem:[#allocation7 + $0x508] ss:$16 sps:$4 sm:$0xff]  }
 0x156   : > { %3115 = vmatprep.subr.bf16.mxu1 %v4419_v16  ;;  %v4491_v10 = vld [vmem:[#allocation7 + $0x70c] ss:$16 sps:$4 sm:$0xff]   ;;  %v4492_v16 = vld [vmem:[#allocation7 + $0x8e8] ss:$16 sps:$4 sm:$0xff]  }
 0x157   : > { %v4494_v14 = vld [vmem:[#allocation7 + $0x8ec] ss:$16 sps:$4 sm:$0xff]  }
 0x158   : > { %3075 = vmatpush1.bf16.msra.mxu0 %v4414_v0  ;;  %v4497_v15 = vld [vmem:[#allocation7 + $0xaec] ss:$16 sps:$4 sm:$0xff]   ;;  %v4495_v0 = vld [vmem:[#allocation7 + $0xae8] ss:$16 sps:$4 sm:$0xff]  }
 0x159   : > { %3116 = vmatpush1.bf16.msra.mxu1 %v4417_v17  ;;  %3076 = vmatprep.subr.bf16.mxu0 %v4422_v42  ;;  %v4500_v17 = vld [vmem:[#allocation7 + $0x8cc] ss:$16 sps:$4 sm:$0xff]  }
 0x15a   : > { %3117 = vmatprep.subr.bf16.mxu1 %v4425_v47  ;;  %v4503_v42 = vld [vmem:[#allocation7 + $0xacc] ss:$16 sps:$4 sm:$0xff]  }
 0x15c   : > { %3077 = vmatpush1.bf16.msra.mxu0 %v4420_v18 }
 0x15d   : > { %3118 = vmatpush1.bf16.msra.mxu1 %v4423_v19  ;;  %3078 = vmatprep.subr.bf16.mxu0 %v4428_v20  ;;  %v4498_v20 = vld [vmem:[#allocation7 + $0x8c8] ss:$16 sps:$4 sm:$0xff]  }
 0x15e   : > { %3119 = vmatprep.subr.bf16.mxu1 %v4431_v21  ;;  %v4501_v21 = vld [vmem:[#allocation7 + $0xac8] ss:$16 sps:$4 sm:$0xff]  }
 0x160   : > { %3079 = vmatpush1.bf16.msra.mxu0 %v4426_v22 }
 0x161   : > { %3120 = vmatpush1.bf16.msra.mxu1 %v4429_v23  ;;  %3080 = vmatprep.subr.bf16.mxu0 %v4434_v24  ;;  %v4506_v24 = vld [vmem:[#allocation7 + $0x8ac] ss:$16 sps:$4 sm:$0xff]  }
 0x162   : > { %3121 = vmatprep.subr.bf16.mxu1 %v4437_v25  ;;  %v4509_v25 = vld [vmem:[#allocation7 + $0xaac] ss:$16 sps:$4 sm:$0xff]  }
 0x164   : > { %3081 = vmatpush1.bf16.msra.mxu0 %v4432_v26 }
 0x165   : > { %3122 = vmatpush1.bf16.msra.mxu1 %v4435_v27  ;;  %3082 = vmatprep.subr.bf16.mxu0 %v4440_v28  ;;  %v4504_v28 = vld [vmem:[#allocation7 + $0x8a8] ss:$16 sps:$4 sm:$0xff]  }
 0x166   : > { %3123 = vmatprep.subr.bf16.mxu1 %v4443_v33  ;;  %v4507_v33 = vld [vmem:[#allocation7 + $0xaa8] ss:$16 sps:$4 sm:$0xff]  }
 0x168   : > { %3083 = vmatpush1.bf16.msra.mxu0 %v4438_v34 }
 0x169   : > { %3124 = vmatpush1.bf16.msra.mxu1 %v4441_v35  ;;  %3084 = vmatprep.subr.bf16.mxu0 %v4446_v36  ;;  %v4512_v36 = vld [vmem:[#allocation7 + $0x88c] ss:$16 sps:$4 sm:$0xff]  }
 0x16a   : > { %3125 = vmatprep.subr.bf16.mxu1 %v4449_v37  ;;  %v4515_v37 = vld [vmem:[#allocation7 + $0xa8c] ss:$16 sps:$4 sm:$0xff]  }
 0x16c   : > { %3085 = vmatpush2.bf16.msra.mxu0 %v4444_v40  ;;  %v4521_v40 = vld [vmem:[#allocation7 + $0xa6c] ss:$16 sps:$4 sm:$0xff]  }
 0x16d   : > { %3126 = vmatpush2.bf16.msra.mxu1 %v4447_v41  ;;  %3086 = vmatprep.subr.bf16.mxu0 %v4452_v44  ;;  %v4516_v41 = vld [vmem:[#allocation7 + $0x868] ss:$16 sps:$4 sm:$0xff]  }
 0x16e   : > { %3127 = vmatprep.subr.bf16.mxu1 %v4455_v48  ;;  %v4519_v44 = vld [vmem:[#allocation7 + $0xa68] ss:$16 sps:$4 sm:$0xff]   ;;  %v4524_v48 = vld [vmem:[#allocation7 + $0x84c] ss:$16 sps:$4 sm:$0xff]  }
 0x170   : > { %3087 = vmatpush2.bf16.msra.mxu0 %v4450_v49  ;;  %v4527_v49 = vld [vmem:[#allocation7 + $0xa4c] ss:$16 sps:$4 sm:$0xff]  }
 0x171   : > { %3128 = vmatpush2.bf16.msra.mxu1 %v4453_v51  ;;  %3088 = vmatprep.subr.bf16.mxu0 %v4458_v52  ;;  %v4522_v51 = vld [vmem:[#allocation7 + $0x848] ss:$16 sps:$4 sm:$0xff]  }
 0x172   : > { %3129 = vmatprep.subr.bf16.mxu1 %v4461_v53  ;;  %v4525_v52 = vld [vmem:[#allocation7 + $0xa48] ss:$16 sps:$4 sm:$0xff]   ;;  %v4530_v53 = vld [vmem:[#allocation7 + $0x82c] ss:$16 sps:$4 sm:$0xff]  }
 0x174   : > { %3089 = vmatpush2.bf16.msra.mxu0 %v4456_v54  ;;  %v4533_v54 = vld [vmem:[#allocation7 + $0xa2c] ss:$16 sps:$4 sm:$0xff]  }
 0x175   : > { %3130 = vmatpush2.bf16.msra.mxu1 %v4459_v55  ;;  %3090 = vmatprep.subr.bf16.mxu0 %v4464_v56  ;;  %v4528_v55 = vld [vmem:[#allocation7 + $0x828] ss:$16 sps:$4 sm:$0xff]  }
 0x176   : > { %3131 = vmatprep.subr.bf16.mxu1 %v4467_v57  ;;  %v4531_v56 = vld [vmem:[#allocation7 + $0xa28] ss:$16 sps:$4 sm:$0xff]   ;;  %v4536_v57 = vld [vmem:[#allocation7 + $0x80c] ss:$16 sps:$4 sm:$0xff]  }
 0x178   : > { %3091 = vmatpush2.bf16.msra.mxu0 %v4462_v58  ;;  %v4539_v58 = vld [vmem:[#allocation7 + $0xa0c] ss:$16 sps:$4 sm:$0xff]  }
 0x179   : > { %3132 = vmatpush2.bf16.msra.mxu1 %v4465_v59  ;;  %3092 = vmatprep.subr.bf16.mxu0 %v4470_v60  ;;  %v4534_v59 = vld [vmem:[#allocation7 + $0x808] ss:$16 sps:$4 sm:$0xff]  }
 0x17a   : > { %3133 = vmatprep.subr.bf16.mxu1 %v4473_v61  ;;  %v4537_v60 = vld [vmem:[#allocation7 + $0xa08] ss:$16 sps:$4 sm:$0xff]   ;;  %v4542_v61 = vld [vmem:[#allocation7 + $0x9ec] ss:$16 sps:$4 sm:$0xff]  }
 0x17c   : > { %3093 = vmatpush2.bf16.msra.mxu0 %v4468_v62  ;;  %v4545_v62 = vld [vmem:[#allocation7 + $0xbec] ss:$16 sps:$4 sm:$0xff]  }
 0x17d   : > { %3134 = vmatpush2.bf16.msra.mxu1 %v4471_v31  ;;  %3094 = vmatprep.subr.bf16.mxu0 %v4476_v32  ;;  %v4540_v31 = vld [vmem:[#allocation7 + $0x9e8] ss:$16 sps:$4 sm:$0xff]  }
 0x17e   : > { %3135 = vmatprep.subr.bf16.mxu1 %v4479_v63  ;;  %v4543_v32 = vld [vmem:[#allocation7 + $0xbe8] ss:$16 sps:$4 sm:$0xff]   ;;  %v4548_v63 = vld [vmem:[#allocation7 + $0x9cc] ss:$16 sps:$4 sm:$0xff]  }
 0x180   : > { %3095 = vmatpush2.bf16.msra.mxu0 %v4474_v3  ;;  %v4551_v3 = vld [vmem:[#allocation7 + $0xbcc] ss:$16 sps:$4 sm:$0xff]  }
 0x181   : > { %3136 = vmatpush2.bf16.msra.mxu1 %v4477_v4  ;;  %3096 = vmatprep.subr.bf16.mxu0 %v4482_v5  ;;  %v4546_v4 = vld [vmem:[#allocation7 + $0x9c8] ss:$16 sps:$4 sm:$0xff]  }
 0x182   : > { %3137 = vmatprep.subr.bf16.mxu1 %v4485_v7  ;;  %v4549_v5 = vld [vmem:[#allocation7 + $0xbc8] ss:$16 sps:$4 sm:$0xff]   ;;  %v4554_v7 = vld [vmem:[#allocation7 + $0x9ac] ss:$16 sps:$4 sm:$0xff]  }
 0x184   : > { %3097 = vmatpush2.bf16.msra.mxu0 %v4480_v8  ;;  %v4557_v8 = vld [vmem:[#allocation7 + $0xbac] ss:$16 sps:$4 sm:$0xff]  }
 0x185   : > { %3138 = vmatpush2.bf16.msra.mxu1 %v4483_v29  ;;  %3098 = vmatprep.subr.bf16.mxu0 %v4488_v30  ;;  %v4552_v29 = vld [vmem:[#allocation7 + $0x9a8] ss:$16 sps:$4 sm:$0xff]  }
 0x186   : > { %3139 = vmatprep.subr.bf16.mxu1 %v4491_v10  ;;  %v4555_v30 = vld [vmem:[#allocation7 + $0xba8] ss:$16 sps:$4 sm:$0xff]   ;;  %v4560_v10 = vld [vmem:[#allocation7 + $0x98c] ss:$16 sps:$4 sm:$0xff]  }
 0x188   : > { %3099 = vmatpush2.bf16.msra.mxu0 %v4486_v11  ;;  %v4563_v11 = vld [vmem:[#allocation7 + $0xb8c] ss:$16 sps:$4 sm:$0xff]  }
 0x189   : > { %3140 = vmatpush2.bf16.msra.mxu1 %v4489_v12  ;;  %3150 = vmatprep.subr.bf16.mxu0 %v4494_v14  ;;  %v4558_v12 = vld [vmem:[#allocation7 + $0x988] ss:$16 sps:$4 sm:$0xff]  }
 0x18a   : > { %3191 = vmatprep.subr.bf16.mxu1 %v4497_v15  ;;  %v4561_v14 = vld [vmem:[#allocation7 + $0xb88] ss:$16 sps:$4 sm:$0xff]   ;;  %v4566_v15 = vld [vmem:[#allocation7 + $0x96c] ss:$16 sps:$4 sm:$0xff]  }
 0x18b   : > { %v2856_v47 = vpop.f32.mrf.mxu0  ;;  %3101 = vmatmul.mubr.bf16.vlgmr.msra.gmra.mxu0 %v4941_v39 }
 0x18c   : > { %v2897_v18 = vpop.f32.mrf.mxu1  ;;  %3142 = vmatmul.mubr.bf16.vlgmr.msra.gmra.mxu1 %v4948_v43  ;;  %v2857_v19 = vadd.f32 %v2856_v47, %v4989_v2  ;;  %3151 = vmatpush1.bf16.msra.mxu0 %v4492_v16  ;;  %v4569_v16 = vld [vmem:[#allocation7 + $0xb6c] ss:$16 sps:$4 sm:$0xff]  }
 0x18d   : > { %3192 = vmatpush1.bf16.msra.mxu1 %v4495_v0  ;;  %v2858_v22 = vpop.f32.mrf.mxu0  ;;  %3152 = vmatprep.subr.bf16.mxu0 %v4500_v17  ;;  %v4564_v0 = vld [vmem:[#allocation7 + $0x968] ss:$16 sps:$4 sm:$0xff]   ;;  %v4575_v47 = vld [vmem:[#allocation7 + $0xb4c] ss:$16 sps:$4 sm:$0xff]  }
 0x18e   : > { %v2899_v23 = vpop.f32.mrf.mxu1  ;;  %3193 = vmatprep.subr.bf16.mxu1 %v4503_v42  ;;  %v4998_v26 = vadd.f32 %v2897_v18, %v2857_v19  ;;  %v2859_v27 = vadd.f32 %v2858_v22, %v4991_v9  ;;  %3182 = vmatprep.mubr.bf16.mxu0 %v4972_v45  ;;  %v4510_v9 = vld [vmem:[#allocation7 + $0x888] ss:$16 sps:$4 sm:$0xff]   ;;  %v4572_v42 = vld [vmem:[#allocation7 + $0x94c] ss:$16 sps:$4 sm:$0xff]  }
 0x18f   : > { %3223 = vmatprep.mubr.bf16.mxu1 %v4980_v50  ;;  %v2860_v39 = vpop.f32.mrf.mxu0  ;;  %v4513_v45 = vld [vmem:[#allocation7 + $0xa88] ss:$16 sps:$4 sm:$0xff]   ;;  %v4518_v50 = vld [vmem:[#allocation7 + $0x86c] ss:$16 sps:$4 sm:$0xff]  }
 0x190   : > { %v2901_v43 = vpop.f32.mrf.mxu1  ;;  %v5003_v2 = vadd.f32 %v2899_v23, %v2859_v27  ;;  %3153 = vmatpush1.bf16.msra.mxu0 %v4498_v20  ;;  %v4567_v17 = vld [vmem:[#allocation7 + $0xb68] ss:$16 sps:$4 sm:$0xff]   ;;  %v4578_v20 = vld [vmem:[#allocation7 + $0x92c] ss:$16 sps:$4 sm:$0xff]  }
 0x191   : > { %3194 = vmatpush1.bf16.msra.mxu1 %v4501_v21  ;;  %v2861_v34 = vpop.f32.mrf.mxu0  ;;  %3154 = vmatprep.subr.bf16.mxu0 %v4506_v24  ;;  %v4570_v18 = vld [vmem:[#allocation7 + $0x948] ss:$16 sps:$4 sm:$0xff]   ;;  %v4581_v21 = vld [vmem:[#allocation7 + $0xb2c] ss:$16 sps:$4 sm:$0xff]  }
 0x192   : > { %v2902_v35 = vpop.f32.mrf.mxu1  ;;  %3195 = vmatprep.subr.bf16.mxu1 %v4509_v25  ;;  %v4573_v19 = vld [vmem:[#allocation7 + $0xb48] ss:$16 sps:$4 sm:$0xff]   ;;  %v4584_v24 = vld [vmem:[#allocation7 + $0x90c] ss:$16 sps:$4 sm:$0xff]  }
 0x193   : > { %v4576_v22 = vld [vmem:[#allocation7 + $0x928] ss:$16 sps:$4 sm:$0xff]   ;;  %v4587_v25 = vld [vmem:[#allocation7 + $0xb0c] ss:$16 sps:$4 sm:$0xff]  }
 0x194   : > { %3155 = vmatpush1.bf16.msra.mxu0 %v4504_v28  ;;  %v4579_v23 = vld [vmem:[#allocation7 + $0xb28] ss:$16 sps:$4 sm:$0xff]  }
 0x195   : > { %3196 = vmatpush1.bf16.msra.mxu1 %v4507_v33  ;;  %3156 = vmatprep.subr.bf16.mxu0 %v4512_v36  ;;  %v4582_v27 = vld [vmem:[#allocation7 + $0x908] ss:$16 sps:$4 sm:$0xff]  }
 0x196   : > { %3197 = vmatprep.subr.bf16.mxu1 %v4515_v37  ;;  %v4585_v39 = vld [vmem:[#allocation7 + $0xb08] ss:$16 sps:$4 sm:$0xff]  }
 0x198   : > { %3157 = vmatpush1.bf16.msra.mxu0 %v4510_v9 }
 0x199   : > { %3198 = vmatpush1.bf16.msra.mxu1 %v4513_v45  ;;  %3158 = vmatprep.subr.bf16.mxu0 %v4518_v50 }
 0x19a   : > { %3199 = vmatprep.subr.bf16.mxu1 %v4521_v40 }
 0x19c   : > { %3159 = vmatpush1.bf16.msra.mxu0 %v4516_v41 }
 0x19d   : > { %3200 = vmatpush1.bf16.msra.mxu1 %v4519_v44  ;;  %3160 = vmatprep.subr.bf16.mxu0 %v4524_v48 }
 0x19e   : > { %3201 = vmatprep.subr.bf16.mxu1 %v4527_v49 }
 0x1a0   : > { %3161 = vmatpush1.bf16.msra.mxu0 %v4522_v51 }
 0x1a1   : > { %3202 = vmatpush1.bf16.msra.mxu1 %v4525_v52  ;;  %3162 = vmatprep.subr.bf16.mxu0 %v4530_v53 }
 0x1a2   : > { %3203 = vmatprep.subr.bf16.mxu1 %v4533_v54 }
 0x1a4   : > { %3163 = vmatpush1.bf16.msra.mxu0 %v4528_v55 }
 0x1a5   : > { %3204 = vmatpush1.bf16.msra.mxu1 %v4531_v56  ;;  %3164 = vmatprep.subr.bf16.mxu0 %v4536_v57 }
 0x1a6   : > { %3205 = vmatprep.subr.bf16.mxu1 %v4539_v58 }
 0x1a8   : > { %3165 = vmatpush1.bf16.msra.mxu0 %v4534_v59 }
 0x1a9   : > { %3206 = vmatpush1.bf16.msra.mxu1 %v4537_v60  ;;  %3166 = vmatprep.subr.bf16.mxu0 %v4542_v61 }
 0x1aa   : > { %3207 = vmatprep.subr.bf16.mxu1 %v4545_v62 }
 0x1ac   : > { %3167 = vmatpush2.bf16.msra.mxu0 %v4540_v31 }
 0x1ad   : > { %3208 = vmatpush2.bf16.msra.mxu1 %v4543_v32  ;;  %3168 = vmatprep.subr.bf16.mxu0 %v4548_v63 }
 0x1ae   : > { %3209 = vmatprep.subr.bf16.mxu1 %v4551_v3 }
 0x1b0   : > { %3169 = vmatpush2.bf16.msra.mxu0 %v4546_v4 }
 0x1b1   : > { %3210 = vmatpush2.bf16.msra.mxu1 %v4549_v5  ;;  %3170 = vmatprep.subr.bf16.mxu0 %v4554_v7 }
 0x1b2   : > { %3211 = vmatprep.subr.bf16.mxu1 %v4557_v8 }
 0x1b4   : > { %3171 = vmatpush2.bf16.msra.mxu0 %v4552_v29 }
 0x1b5   : > { %3212 = vmatpush2.bf16.msra.mxu1 %v4555_v30  ;;  %3172 = vmatprep.subr.bf16.mxu0 %v4560_v10 }
 0x1b6   : > { %3213 = vmatprep.subr.bf16.mxu1 %v4563_v11 }
 0x1b8   : > { %3173 = vmatpush2.bf16.msra.mxu0 %v4558_v12 }
 0x1b9   : > { %3214 = vmatpush2.bf16.msra.mxu1 %v4561_v14  ;;  %3174 = vmatprep.subr.bf16.mxu0 %v4566_v15 }
 0x1ba   : > { %3215 = vmatprep.subr.bf16.mxu1 %v4569_v16 }
 0x1bc   : > { %3175 = vmatpush2.bf16.msra.mxu0 %v4564_v0 }
 0x1bd   : > { %3216 = vmatpush2.bf16.msra.mxu1 %v4567_v17  ;;  %3176 = vmatprep.subr.bf16.mxu0 %v4572_v42 }
 0x1be   : > { %3217 = vmatprep.subr.bf16.mxu1 %v4575_v47 }
 0x1c0   : > { %3177 = vmatpush2.bf16.msra.mxu0 %v4570_v18 }
 0x1c1   : > { %3218 = vmatpush2.bf16.msra.mxu1 %v4573_v19  ;;  %3178 = vmatprep.subr.bf16.mxu0 %v4578_v20 }
 0x1c2   : > { %3219 = vmatprep.subr.bf16.mxu1 %v4581_v21 }
 0x1c4   : > { %3179 = vmatpush2.bf16.msra.mxu0 %v4576_v22 }
 0x1c5   : > { %3220 = vmatpush2.bf16.msra.mxu1 %v4579_v23  ;;  %3180 = vmatprep.subr.bf16.mxu0 %v4584_v24 }
 0x1c6   : > { %3221 = vmatprep.subr.bf16.mxu1 %v4587_v25 }
 0x1c8   : > { %3181 = vmatpush2.bf16.msra.mxu0 %v4582_v27 }
 0x1c9   : > { %3222 = vmatpush2.bf16.msra.mxu1 %v4585_v39 }
 0x1cb   : > { %v2938_v43 = vpop.f32.mrf.mxu0  ;;  %3183 = vmatmul.mubr.bf16.vlgmr.msra.gmra.mxu0 %v4968_v38 }
 0x1cc   : > { %v2979_v28 = vpop.f32.mrf.mxu1  ;;  %3224 = vmatmul.mubr.bf16.vlgmr.msra.gmra.mxu1 %v4975_v46  ;;  %v2939_v33 = vadd.f32 %v2938_v43, %v4998_v26 }
 0x1cd   : > { %v2940_v34 = vpop.f32.mrf.mxu0 }
 0x1ce   : > { %v2981_v35 = vpop.f32.mrf.mxu1  ;;  %v5008_v36 = vadd.f32 %v2979_v28, %v2939_v33  ;;  %v2941_v37 = vadd.f32 %v2940_v34, %v5003_v2 }
 0x1cf   : > { %v2942_v9 = vpop.f32.mrf.mxu0 }
 0x1d0   : > { %v2983_v45 = vpop.f32.mrf.mxu1  ;;  %v3233_v50 = vsel %vm3232_vm15, %v5008_v36, 0.0  ;;  %v3291_v40 = vmul.f32 %v5008_v36, %v5008_v36  ;;  %v5015_v38 = vadd.f32 %v2981_v35, %v2941_v37 }
 0x1d1   : > { %v3234_v46 = vrot.slane %v3233_v50, 4  ;;  %v2943_v41 = vpop.f32.mrf.mxu0 }
 0x1d2   : > { %v2984_v26 = vpop.f32.mrf.mxu1  ;;  %v3295_v44 = vsel %vm3232_vm15, %v3291_v40, 0.0  ;;  %v3240_v48 = vsel %vm3232_vm15, %v5015_v38, 0.0  ;;  %v3292_v2 = vmul.f32 %v5015_v38, %v5015_v38  ;;  %v3931_v49 = vpack.c.bf16 %v5015_v38, %v5008_v36 }
 0x1d3   : > { %v3235_v51 = vadd.f32 %v3234_v46, %v3233_v50  ;;  %v3296_v52 = vrot.slane %v3295_v44, 4  ;;  %v3241_v53 = vrot.slane %v3240_v48, 4 }
 0x1d4   : > { %v3302_v54 = vsel %vm3232_vm15, %v3292_v2, 0.0 }
 0x1d5   : > { %v3236_v55 = vrot.slane %v3235_v51, 2  ;;  %v3297_v56 = vadd.f32 %v3296_v52, %v3295_v44  ;;  %v3242_v57 = vadd.f32 %v3241_v53, %v3240_v48  ;;  %v3303_v58 = vrot.slane %v3302_v54, 4 }
 0x1d7   : > { %v3237_v59 = vadd.f32 %v3236_v55, %v3235_v51  ;;  %v3298_v60 = vrot.slane %v3297_v56, 2  ;;  %v3243_v61 = vrot.slane %v3242_v57, 2  ;;  %v3304_v62 = vadd.f32 %v3303_v58, %v3302_v54 }
 0x1d9   : > { %v3238_v31 = vrot.slane %v3237_v59, 1  ;;  %v3299_v32 = vadd.f32 %v3298_v60, %v3297_v56  ;;  %v3244_v63 = vadd.f32 %v3243_v61, %v3242_v57  ;;  %v3305_v3 = vrot.slane %v3304_v62, 2 }
 0x1db   : > { %v3300_v4 = vrot.slane %v3299_v32, 1  ;;  %v3245_v5 = vrot.slane %v3244_v63, 1  ;;  %v3306_v7 = vadd.f32 %v3305_v3, %v3304_v62  ;;  %v5025_v8 = vadd.f32 %v3238_v31, %v3237_v59 }
 0x1dc   : > { %v4748_v31 = vmov 1966171168  }
 0x1dd   : > { %v5027_v29 = vadd.f32 %v3245_v5, %v3244_v63  ;;  %v3307_v30 = vrot.slane %v3306_v7, 1  ;;  %v5029_v10 = vadd.f32 %v3300_v4, %v3299_v32  ;;  %v3268_v32 = vunpack.c.l.s4 %v4748_v31 }
 0x1de   : > { %v3370_v63 = vrot.slane %v3931_v49, %v4907_v13 }
 0x1df   : > { %v3265_v11 = vcombine.low %v5025_v8, %v5027_v29  ;;  %v5033_v12 = vadd.f32 %v3307_v30, %v3306_v7 }
 0x1e1   : > { %v3327_v14 = vcombine.low %v5029_v10, %v5033_v12 }
 0x20b   : > { %v3020_v15 = vpop.f32.mrf.mxu0 }
 0x20c   : > { %v3061_v16 = vpop.f32.mrf.mxu1 }
 0x20d   : > { %v3062_v0 = vadd.f32 %v3061_v16, %v3020_v15  ;;  %v3022_v17 = vpop.f32.mrf.mxu0 }
 0x20e   : > { %v3063_v42 = vpop.f32.mrf.mxu1 }
 0x20f   : > { %v3064_v47 = vadd.f32 %v3063_v42, %v3022_v17  ;;  %v3024_v18 = vpop.f32.mrf.mxu0 }
 0x210   : > { %v3065_v19 = vpop.f32.mrf.mxu1 }
 0x211   : > { %v3025_v20 = vpop.f32.mrf.mxu0 }
 0x212   : > { %v3066_v21 = vpop.f32.mrf.mxu1 }
 0x24b   : > { %v3102_v22 = vpop.f32.mrf.mxu0 }
 0x24c   : > { %v3143_v23 = vpop.f32.mrf.mxu1  ;;  %v3103_v24 = vadd.f32 %v3102_v22, %v3062_v0  ;;  %v3269_v0 = vunpack.c.0.s8 %v3268_v32 }
 0x24d   : > { %v3104_v25 = vpop.f32.mrf.mxu0 }
 0x24e   : > { %v3145_v27 = vpop.f32.mrf.mxu1  ;;  %v3144_v39 = vadd.f32 %v3143_v23, %v3103_v24  ;;  %v3105_v35 = vadd.f32 %v3104_v25, %v3064_v47 }
 0x24f   : > { %v3106_v43 = vpop.f32.mrf.mxu0 }
 0x250   : > { %v3147_v28 = vpop.f32.mrf.mxu1  ;;  %v3146_v45 = vadd.f32 %v3145_v27, %v3105_v35 }
 0x251   : > { %v3107_v33 = vpop.f32.mrf.mxu0 }
 0x252   : > { %v3148_v34 = vpop.f32.mrf.mxu1 }
 0x28b   : > { %v3184_v37 = vpop.f32.mrf.mxu0 }
 0x28c   : > { %v3225_v9 = vpop.f32.mrf.mxu1  ;;  %v3185_v50 = vadd.f32 %v3184_v37, %v3144_v39 }
 0x28d   : > { %v3186_v40 = vpop.f32.mrf.mxu0 }
 0x28e   : > { %v3227_v46 = vpop.f32.mrf.mxu1  ;;  %v3226_v41 = vadd.f32 %v3225_v9, %v3185_v50  ;;  %v3187_v26 = vadd.f32 %v3186_v40, %v3146_v45 }
 0x28f   : > { %v3188_v44 = vpop.f32.mrf.mxu0 }
 0x290   : > { %v3229_v48 = vpop.f32.mrf.mxu1  ;;  %v3247_v2 = vsel %vm3232_vm15, %v3226_v41, 0.0  ;;  %v3293_v51 = vmul.f32 %v3226_v41, %v3226_v41  ;;  %v3228_v52 = vadd.f32 %v3227_v46, %v3187_v26 }
 0x291   : > { %v3248_v53 = vrot.slane %v3247_v2, 4  ;;  %v3189_v54 = vpop.f32.mrf.mxu0 }
 0x292   : > { %v3230_v55 = vpop.f32.mrf.mxu1  ;;  %v3309_v56 = vsel %vm3232_vm15, %v3293_v51, 0.0  ;;  %v3254_v57 = vsel %vm3232_vm15, %v3228_v52, 0.0  ;;  %v3294_v58 = vmul.f32 %v3228_v52, %v3228_v52  ;;  %v3932_v59 = vpack.c.bf16 %v3228_v52, %v3226_v41 }
 0x293   : > { %v3249_v60 = vadd.f32 %v3248_v53, %v3247_v2  ;;  %v3310_v61 = vrot.slane %v3309_v56, 4  ;;  %v3255_v62 = vrot.slane %v3254_v57, 4 }
 0x294   : > { %v3316_v3 = vsel %vm3232_vm15, %v3294_v58, 0.0  ;;  %v3377_v4 = vrot.slane %v3932_v59, %v4907_v13 }
 0x295   : > { %v3250_v5 = vrot.slane %v3249_v60, 2  ;;  %v3311_v7 = vadd.f32 %v3310_v61, %v3309_v56  ;;  %v3256_v30 = vadd.f32 %v3255_v62, %v3254_v57  ;;  %v3317_v15 = vrot.slane %v3316_v3, 4 }
 0x296   : > { %v3378_v16 = vcombine.low %v3370_v63, %v3377_v4 }
 0x297   : > { %v3251_v36 = vadd.f32 %v3250_v5, %v3249_v60  ;;  %v3312_v38 = vrot.slane %v3311_v7, 2  ;;  %v3257_v13 = vrot.slane %v3256_v30, 2  ;;  %v3318_v49 = vadd.f32 %v3317_v15, %v3316_v3 }
 0x298   : > { %3380 = vst [vmem:[%s205_s17] sm:$0xff] %v3378_v16 }
 0x299   : > { %v3252_v17 = vrot.slane %v3251_v36, 1  ;;  %v3313_v42 = vadd.f32 %v3312_v38, %v3311_v7  ;;  %v3258_v47 = vadd.f32 %v3257_v13, %v3256_v30  ;;  %v3319_v18 = vrot.slane %v3318_v49, 2 }
 0x29a   : > { %4655 = shalt.err (!%p4652_p0)
}
 0x29b   : > { %s4656_s9 = scalar_lea.hbm %s5055_s28, 128  ;;  %s4660_s26 = scalar_lea.hbm %s5137_s2, 256 }
 0x29c   : > { %p4657_p5 = scmp.ne.s32.totalorder %s5055_s28, %s4656_s9  ;;  %p4661_p1 = scmp.lt.s32.totalorder %s5055_s28, %s5137_s2 }
 0x29d   : > { %p4662_p4 = scmp.lt.s32.totalorder %s4660_s26, %s4656_s9 }
 0x29e   : > { %p4658_p9 = pnand %p4657_p5, %p5160_p3 }
 0x29f   : > { %p4663_p6 = por %p4662_p4, %p4661_p1 }
 0x2a0   : > { %p4659_p12 = pneg %p4658_p9 }
 0x2a2   : > { %p4664_p8 = pnand %p4663_p6, %p4659_p12 }
 0x2a4   : > { %4667 = shalt.err (!%p4664_p8)
}
 0x2a5   : > { %3951 = dma.vmem_to_hbm [thread:$0]  (%p5160_p3), %s5057_s22, 128, %s5055_s28, %s3382_s29   ;;  %v3314_v19 = vrot.slane %v3313_v42, 1  ;;  %v3259_v20 = vrot.slane %v3258_v47, 1  ;;  %v3320_v21 = vadd.f32 %v3319_v18, %v3318_v49  ;;  %v3272_v22 = vsub.s32 %v3269_v0, %v4904_v6 }
 0x2a6   : > { %v3253_v23 = vadd.f32 %v3252_v17, %v3251_v36  ;;  %s212_s22 = scalar_lea.vmem [#allocation10], %s3537_s18  ;;  %s5094_s29 = scalar_lea.hbm %s5138_s3, %s3942_s20 }
 0x2a7   : > { %v3260_v24 = vadd.f32 %v3259_v20, %v3258_v47  ;;  %v3321_v25 = vrot.slane %v3320_v21, 1  ;;  %v3315_v27 = vadd.f32 %v3314_v19, %v3313_v42  ;;  %v3273_v28 = vrot.slane %v3265_v11, %v3272_v22  ;;  %s3415_s23 = sshll.u32 %s212_s22, 4  ;;  %s3387_s30 = scalar_lea.sflag [#allocation11], %s4878_s11  ;;  %s3416_s23 = int_to_ptr.vmem [resolvable:$true] %s3415_s23 }
 0x2a8   : > { %v3335_v35 = vrot.slane %v3327_v14, %v3272_v22  ;;  %s4668_s4 = scalar_lea.vmem %s3416_s23, 128  ;;  %s4750_s16 = smov [#allocation10]  }
 0x2a9   : > { %v3266_v39 = vcombine.low %v3253_v23, %v3260_v24  ;;  %v3322_v43 = vadd.f32 %v3321_v25, %v3320_v21  ;;  %p4669_p11 = scmp.ne.s32.totalorder %s3416_s23, %s4668_s4  ;;  %s4672_s18 = sshll.u32 %s4750_s16, 4  ;;  %s4673_s18 = int_to_ptr.vmem [resolvable:$false] %s4672_s18 }
 0x2aa   : > { %s4674_s8 = scalar_lea.vmem %s4673_s18, 256  ;;  %p4675_p2 = scmp.lt.s32.totalorder %s3416_s23, %s4673_s18 }
 0x2ab   : > { %v3280_v33 = vrot.slane %v3266_v39, %v3272_v22  ;;  %v3328_v34 = vcombine.low %v3315_v27, %v3322_v43  ;;  %p4670_p7 = pnand %p4669_p11, %p5160_p3  ;;  %p4676_p13 = scmp.lt.s32.totalorder %s4674_s8, %s4668_s4 }
 0x2ad   : > { %v3281_v6 = vcombine.low %v3273_v28, %v3280_v33  ;;  %v3342_v37 = vrot.slane %v3328_v34, %v3272_v22  ;;  %p4671_p10 = pneg %p4670_p7  ;;  %p4677_p0 = por %p4676_p13, %p4675_p2 }
 0x2af   : > { %v3343_v9 = vcombine.low %v3335_v35, %v3342_v37  ;;  %v3288_v45 = vrot.slane %v3281_v6, %v3272_v22  ;;  %p4678_p5 = pnand %p4677_p0, %p4671_p10 }
 0x2b1   : > { %3290 = vst.msk [vmem:[%s212_s22] ss:$2 sm:$0xf] %vm4893_vm0, %v3288_v45  ;;  %v3350_v8 = vrot.slane %v3343_v9, %v3272_v22 }
 0x2b3   : > { %3930 = vst.msk [vmem:[%s212_s22 + $0x1] ss:$2 sm:$0xf] %vm4893_vm0, %v3350_v8 }
 0x2b4   : > { %4681 = shalt.err (!%p4678_p5)
}
 0x2b5   : > { %s4682_s20 = scalar_lea.hbm %s5094_s29, 128  ;;  %s4686_s9 = scalar_lea.hbm %s5138_s3, 256 }
 0x2b6   : > { %p4683_p9 = scmp.ne.s32.totalorder %s5094_s29, %s4682_s20  ;;  %p4687_p4 = scmp.lt.s32.totalorder %s5094_s29, %s5138_s3 }
 0x2b7   : > { %p4688_p6 = scmp.lt.s32.totalorder %s4686_s9, %s4682_s20 }
 0x2b8   : > { %p4684_p12 = pnand %p4683_p9, %p5160_p3 }
 0x2b9   : > { %p4689_p8 = por %p4688_p6, %p4687_p4 }
 0x2ba   : > { %p4685_p1 = pneg %p4684_p12 }
 0x2bc   : > { %p4690_p11 = pnand %p4689_p8, %p4685_p1 }
 0x2be   : > { %4693 = shalt.err (!%p4690_p11)
}
 0x2bf   : > { %3952 = dma.vmem_to_hbm [thread:$0]  (%p5160_p3), %s3416_s23, 128, %s5094_s29, %s3387_s30  }
 0x2c0 PF: > { %s3427_s26 = sand.u32 1, %s4728_s12   ;;  %p5161_p7 = scmp.ne.s32.totalorder %s5144_s19, 0 }
 0x2c1   : > { %p5162_p10 = scmp.ge.s32.totalorder %s4740_s15, 2  ;;  %s3428_s27 = scalar_lea.sflag [#allocation6], %s3427_s26 }
 0x2c3   : > { %p3964_p2 = pnand %p5162_p10, %p5161_p7 }
 0x2c5   : > { %p3965_p13 = pneg %p3964_p2 }
 0x2c7   : > { %4719 = dma.done.wait (%p3965_p13), %s3428_s27, 128  }
 0x2c8   : > { %4721 = vsyncadd (%p3965_p13), %s3428_s27, 4294967168  ;;  %s3437_s17 = scalar_lea.sflag [#allocation11], %s3427_s26 }
 0x2c9   : > { %4723 = dma.done.wait (%p3965_p13), %s3437_s17, 128  }
 0x2ca   : > { %4725 = vsyncadd (%p3965_p13), %s3437_s17, 4294967168  ;;  %p21_p3 = scmp.ge.s32.totalorder %s4825_s24, 4   ;;  %s5163_s12 = smov %s4732_s13 }
 0x2cb   : > { %s5164_s13 = smov %s4736_s14  ;;  %s5165_s14 = smov %s4842_s5 }
 0x2cc   : > { %s5166_s15 = smov %s4825_s24  ;;  %23 = sbr.rel (!%p21_p3) target bundleno = 8 (0x8), region = 96 }
 0x2d1   :  { %3442 = vsyncpa [#allocation5], 1 }
 0x2d2   :  { %3444 = vsyncpa [#allocation5 + $0x1], 1 }
 0x2d3   :  { %3445 = vsyncpa [#allocation8], 1 }
 0x2d4   :  { %3446 = vsyncpa [#allocation6], 1 }
 0x2d5   :  { %3448 = vsyncpa [#allocation6 + $0x1], 1 }
 0x2d6   :  { %3449 = vsyncpa [#allocation11], 1 }
 0x2d7   :  { %3451 = vsyncpa [#allocation11 + $0x1], 1 }

</bundles_post_ra>
